<compile_context>
chip_gen: v6e
topology: v6e:2x2x1
jax: 0.10.0
libtpu: 0.0.40
codegen_flags: <defaults>
</compile_context>

<pallas_src>
import functools

import jax
import jax.numpy as jnp
from jax.experimental import pallas as pl
from jax.experimental.pallas import tpu as pltpu

_HIGHEST = jax.lax.Precision.HIGHEST


def _excitation(y, w1_ref, b1_ref, w2_ref, b2_ref, alpha_ref):
    """fc1 -> PReLU -> fc2 -> sigmoid on pooled activations y (TB, C), f32.

    The MLP operands are tiny (C x H), so f32 + HIGHEST here costs ~nothing."""
    h = jnp.dot(y, w1_ref[...], precision=_HIGHEST,
                preferred_element_type=jnp.float32) + b1_ref[...]
    a = alpha_ref[0]                                   # scalar PReLU slope (SMEM)
    h = jnp.where(h > 0, h, a * h)
    z = jnp.dot(h, w2_ref[...], precision=_HIGHEST,
                preferred_element_type=jnp.float32) + b2_ref[...]
    return jax.nn.sigmoid(z)                           # (TB, C) f32


def se_kernel_flat(x_ref, w1_ref, b1_ref, w2_ref, b2_ref,
                   pool_ref, expand_ref, alpha_ref, o_ref, *, inv_len):
    # x_ref / o_ref: (TB, C*L) lane-dense blocks.
    # Squeeze: per-channel sum over L on the MXU (pool is a 0/1 one-hot), f32 accumulate,
    # then a tiny f32 multiply by 1/L. No whole-block cast of x. f32 inputs keep HIGHEST
    # for exactness (documented trade-off); bf16 inputs run native MXU passes.
    exact = x_ref.dtype == jnp.float32
    y = jnp.dot(x_ref[...], pool_ref[...],
                precision=_HIGHEST if exact else None,
                preferred_element_type=jnp.float32) * inv_len       # (TB, C) mean, f32
    s = _excitation(y, w1_ref, b1_ref, w2_ref, b2_ref, alpha_ref)   # (TB, C) f32
    # Broadcast the per-channel scale back to the lane-dense layout on the MXU,
    # producing s_flat directly in the output dtype (expand is 0/1 -> exact copies).
    s_flat = jnp.dot(s.astype(expand_ref.dtype), expand_ref[...],
                     precision=_HIGHEST if o_ref.dtype == jnp.float32 else None,
                     preferred_element_type=o_ref.dtype)            # (TB, C*L)
    # Scale in the I/O dtype; x_ref is re-read here (no f32 tile copy held live).
    o_ref[...] = (x_ref[...] * s_flat).astype(o_ref.dtype)


def se_kernel_3d(x_ref, w1_ref, b1_ref, w2_ref, b2_ref, alpha_ref, o_ref):
    # Fallback for shapes where the pool/expand constants would not fit VMEM.
    # x_ref / o_ref: (TB, C, L) blocks.
    y = jnp.mean(x_ref[...].astype(jnp.float32), axis=-1)               # (TB, C)
    s = _excitation(y, w1_ref, b1_ref, w2_ref, b2_ref, alpha_ref)       # (TB, C)
    o_ref[...] = (x_ref[...] * s.astype(o_ref.dtype)[:, :, None]).astype(o_ref.dtype)


def _tpu_generation():
    """(physical VMEM bytes per TensorCore, TensorCores sharing the 'parallel' grid)."""
    try:
        kind = jax.devices()[0].device_kind.lower()
    except Exception:
        kind = ""
    if "v7" in kind:
        return 64 << 20, 2            # v7x: 64 MiB / TC, 2 TCs per chip
    if "v6" in kind or "v5" in kind or "v4" in kind:
        return 128 << 20, 1           # v5e / v6e: 128 MiB, single TensorCore
    return 16 << 20, 1                # unknown / older generation: be conservative


def _choose_tb(B, per_row_bytes, budget_bytes, pack, cores, max_rows=None):
    """Rows per grid step, sized against the real (double-buffered) VMEM footprint."""
    tb = max(1, budget_bytes // max(1, per_row_bytes))
    tb = min(tb, B)
    if max_rows is not None:
        tb = min(tb, max_rows)
    if cores > 1 and tb >= B and B >= 2 * pack:
        # v7x only: split a single full block in two so both TensorCores get work.
        tb = ((-(-B // 2)) + pack - 1) // pack * pack
    if tb < B:
        # Blocks that do not cover all of B must be sublane-aligned (dtype-packed).
        tb = max(pack, (tb // pack) * pack)
        if cores > 1:
            # Keep an even number of grid steps so neither v7x core idles.
            t = tb
            while t >= pack and ((-(-B // t)) % 2) != 0:
                t -= pack
            if t >= pack:
                tb = t
    return min(tb, B)


def se_layer(x, w1_t, b1, w2_t, b2, alpha, *, force_3d=False, max_rows_per_block=None):
    """x: (B, C, L); w1_t: (C, H); b1: (1, H); w2_t: (H, C); b2: (1, C); alpha: (1,)."""
    B, C, L = x.shape
    H = w1_t.shape[1]
    alpha = jnp.asarray(alpha, jnp.float32).reshape((1,))

    vmem_total, cores = _tpu_generation()
    out_dtype = x.dtype
    in_bytes = x.dtype.itemsize
    out_bytes = jnp.dtype(out_dtype).itemsize
    CL = C * L

    # Constants live in the input/output dtype (0/1 entries are exact in bf16).
    pool_dtype = x.dtype if jnp.issubdtype(x.dtype, jnp.floating) else jnp.float32
    pool_bytes = CL * C * jnp.dtype(pool_dtype).itemsize
    expand_bytes = C * CL * out_bytes
    weight_bytes = 2 * 4 * (C * H + H + H * C + C)            # fc weights, double-buffered
    const_bytes = 2 * (pool_bytes + expand_bytes) + weight_bytes  # pipeline double-buffers

    # Flat path gate: the constant matrices must stay a small fraction of VMEM
    # (vmem_total // 8 -> ~2 MiB per matrix per buffer on v7x's 64 MiB VMEM).
    flat_ok = (not force_3d) and (2 * (pool_bytes + expand_bytes) <= vmem_total // 8)

    # Real per-row footprint: double-buffered x and out blocks plus the in-kernel
    # s_flat intermediate and the re-read of x.
    per_row = CL * (3 * in_bytes + 3 * out_bytes)
    resident_const = const_bytes if flat_ok else weight_bytes
    budget = int(vmem_total * 0.70) - resident_const - (2 << 20)
    pack = max(8, 32 // max(1, in_bytes))     # sublane packing: 8 f32 / 16 bf16 / 32 int8
    TB = _choose_tb(B, per_row, budget, pack, cores, max_rows_per_block)
    grid_steps = -(-B // TB)                  # ceil-div; last block is partial/masked

    footprint = TB * per_row + resident_const + (2 << 20)
    # TODO(synk): if a single TB=pack block still exceeds physical VMEM (huge C*L),
    # the C*L axis itself would need to be split; not implemented here.
    vmem_limit = int(min(max(footprint + (4 << 20), 32 << 20), vmem_total - (2 << 20)))
    compiler_params = pltpu.CompilerParams(
        dimension_semantics=("parallel",),
        vmem_limit_bytes=vmem_limit,
    )
    smem_spec = pl.BlockSpec(memory_space=pltpu.MemorySpace.SMEM)

    if flat_ok:
        # pool[c*L + l, c] = 1 ; expand[c, c*L + l] = 1  (0/1 one-hots; the 1/L mean
        # scaling is applied as an f32 scalar multiply inside the kernel).
        ch_of = jnp.arange(CL, dtype=jnp.int32) // L
        onehot = ch_of[:, None] == jnp.arange(C, dtype=jnp.int32)[None, :]
        pool = onehot.astype(pool_dtype)                        # (C*L, C)
        expand = onehot.T.astype(out_dtype)                     # (C, C*L)

        x_flat = x.reshape(B, CL)
        kernel = functools.partial(se_kernel_flat, inv_len=float(1.0 / L))
        out_flat = pl.pallas_call(
            kernel,
            out_shape=jax.ShapeDtypeStruct((B, CL), out_dtype),
            grid_spec=pltpu.PrefetchScalarGridSpec(
                num_scalar_prefetch=0,
                grid=(grid_steps,),
                in_specs=[
                    pl.BlockSpec((TB, CL), lambda b: (b, 0)),   # x (lane-dense)
                    pl.BlockSpec((C, H), lambda b: (0, 0)),     # w1^T
                    pl.BlockSpec((1, H), lambda b: (0, 0)),     # b1
                    pl.BlockSpec((H, C), lambda b: (0, 0)),     # w2^T
                    pl.BlockSpec((1, C), lambda b: (0, 0)),     # b2
                    pl.BlockSpec((CL, C), lambda b: (0, 0)),    # pool one-hot
                    pl.BlockSpec((C, CL), lambda b: (0, 0)),    # expand one-hot
                    smem_spec,                                  # PReLU slope (SMEM)
                ],
                out_specs=pl.BlockSpec((TB, CL), lambda b: (b, 0)),
            ),
            compiler_params=compiler_params,
        )(x_flat, w1_t, b1, w2_t, b2, pool, expand, alpha)
        return out_flat.reshape(B, C, L)

    # Fallback: full (C, L) as the last two (full-extent) block dims.
    return pl.pallas_call(
        se_kernel_3d,
        out_shape=jax.ShapeDtypeStruct((B, C, L), out_dtype),
        grid_spec=pltpu.PrefetchScalarGridSpec(
            num_scalar_prefetch=0,
            grid=(grid_steps,),
            in_specs=[
                pl.BlockSpec((TB, C, L), lambda b: (b, 0, 0)),  # x
                pl.BlockSpec((C, H), lambda b: (0, 0)),         # w1^T
                pl.BlockSpec((1, H), lambda b: (0, 0)),         # b1
                pl.BlockSpec((H, C), lambda b: (0, 0)),         # w2^T
                pl.BlockSpec((1, C), lambda b: (0, 0)),         # b2
                smem_spec,                                      # PReLU slope (SMEM)
            ],
            out_specs=pl.BlockSpec((TB, C, L), lambda b: (b, 0, 0)),
        ),
        compiler_params=compiler_params,
    )(x, w1_t, b1, w2_t, b2, alpha)


def se_layer_ref(x, w1_t, b1, w2_t, b2, alpha):
    """Plain-JAX reference of the PyTorch forward (computed in f32)."""
    xf = x.astype(jnp.float32)
    y = jnp.mean(xf, axis=-1)                                   # (B, C)
    h = jnp.dot(y, w1_t, precision=_HIGHEST) + b1
    h = jnp.where(h > 0, h, jnp.asarray(alpha, jnp.float32).reshape(()) * h)
    z = jnp.dot(h, w2_t, precision=_HIGHEST) + b2
    s = jax.nn.sigmoid(z)
    return (xf * s[:, :, None]).astype(x.dtype)


def _run_case(key, B, C, L, reduction, *, dtype=jnp.float32, force_3d=False,
              max_rows_per_block=None, atol=1e-5, rtol=1e-5):
    H = max(1, C // reduction)
    kx, k1, kb1, k2, kb2 = jax.random.split(key, 5)
    x = jax.random.normal(kx, (B, C, L), dtype=jnp.float32).astype(dtype)

    # nn.Linear / nn.PReLU style init:
    #   fc1.weight (H, C) -> stored transposed (C, H); fc1.bias (H,)
    #   fc2.weight (C, H) -> stored transposed (H, C); fc2.bias (C,)
    #   PReLU weight: scalar, PyTorch default 0.25
    bound1 = 1.0 / (C ** 0.5)
    bound2 = 1.0 / (H ** 0.5)
    w1_t = jax.random.uniform(k1, (C, H), jnp.float32, -bound1, bound1)
    b1 = jax.random.uniform(kb1, (1, H), jnp.float32, -bound1, bound1)
    w2_t = jax.random.uniform(k2, (H, C), jnp.float32, -bound2, bound2)
    b2 = jax.random.uniform(kb2, (1, C), jnp.float32, -bound2, bound2)
    alpha = jnp.full((1,), 0.25, dtype=jnp.float32)

    out = jax.block_until_ready(
        se_layer(x, w1_t, b1, w2_t, b2, alpha, force_3d=force_3d,
                 max_rows_per_block=max_rows_per_block))
    ref = se_layer_ref(x, w1_t, b1, w2_t, b2, alpha)
    assert out.shape == (B, C, L)
    assert out.dtype == x.dtype
    o32 = out.astype(jnp.float32)
    r32 = ref.astype(jnp.float32)
    err = float(jnp.max(jnp.abs(o32 - r32)))
    assert jnp.allclose(o32, r32, atol=atol, rtol=rtol), f"max abs err {err}"


if __name__ == "__main__":
    key = jax.random.PRNGKey(0)
    k1, k2, k3, k4 = jax.random.split(key, 4)
    # Lane-dense flat path, f32 (exact pool/expand): C*L = 512, batch-blocked.
    _run_case(k1, B=16, C=32, L=16, reduction=8)
    # Lane-dense flat path, bf16: native-MXU pool/expand, bf16 s_flat and stores.
    _run_case(k2, B=16, C=32, L=16, reduction=8, dtype=jnp.bfloat16, atol=0.1, rtol=0.05)
    # Flat path with C*L not a multiple of 128 and a partial (masked) last batch block.
    _run_case(k3, B=20, C=16, L=10, reduction=4, max_rows_per_block=8)
    # Explicit 3D fallback path (constants-too-big / forced).
    _run_case(k4, B=3, C=16, L=10, reduction=4, force_3d=True)
    print("KERNEL_OK")
</pallas_src>

<mosaic_0001>
module attributes {stable_mosaic.version = 11 : i64} {
  func.func @se_kernel_flat(%arg0: i32, %arg1: memref<16x512xf32, #tpu.memory_space<vmem>>, %arg2: memref<32x4xf32, #tpu.memory_space<vmem>>, %arg3: memref<1x4xf32, #tpu.memory_space<vmem>>, %arg4: memref<4x32xf32, #tpu.memory_space<vmem>>, %arg5: memref<1x32xf32, #tpu.memory_space<vmem>>, %arg6: memref<512x32xf32, #tpu.memory_space<vmem>>, %arg7: memref<32x512xf32, #tpu.memory_space<vmem>>, %arg8: memref<1xf32, #tpu.memory_space<smem>>, %arg9: memref<16x512xf32, #tpu.memory_space<vmem>>) attributes {dimension_semantics = [#tpu.dimension_semantics<parallel>], iteration_bounds = array<i64: 1>, scalar_prefetch = 0 : i64, scratch_operands = 0 : i64, tpu.core_type = #tpu.core_type<tc>, window_params = [{transform_indices = @transform_0, window_bounds = array<i64: 16, 512>}, {pipeline_mode = #tpu.pipeline_mode<synchronous>, transform_indices = @transform_1, window_bounds = array<i64: 32, 4>}, {pipeline_mode = #tpu.pipeline_mode<synchronous>, transform_indices = @transform_2, window_bounds = array<i64: 1, 4>}, {pipeline_mode = #tpu.pipeline_mode<synchronous>, transform_indices = @transform_3, window_bounds = array<i64: 4, 32>}, {pipeline_mode = #tpu.pipeline_mode<synchronous>, transform_indices = @transform_4, window_bounds = array<i64: 1, 32>}, {pipeline_mode = #tpu.pipeline_mode<synchronous>, transform_indices = @transform_5, window_bounds = array<i64: 512, 32>}, {pipeline_mode = #tpu.pipeline_mode<synchronous>, transform_indices = @transform_6, window_bounds = array<i64: 32, 512>}, {transform_indices = @transform_7, window_bounds = array<i64: 1>}, {transform_indices = @transform_8, window_bounds = array<i64: 16, 512>}]} {
    %c0 = arith.constant 0 : index
    %c0_0 = arith.constant 0 : index
    %0 = vector.load %arg1[%c0, %c0_0] : memref<16x512xf32, #tpu.memory_space<vmem>>, vector<16x512xf32>
    %c0_1 = arith.constant 0 : index
    %c0_2 = arith.constant 0 : index
    %1 = vector.load %arg6[%c0_1, %c0_2] : memref<512x32xf32, #tpu.memory_space<vmem>>, vector<512x32xf32>
    %cst = arith.constant dense<0.000000e+00> : vector<16x32xf32>
    %2 = tpu.matmul %0, %1, %cst {dimension_numbers = #tpu.dot_dimension_numbers<[1], [0], [0], [1], [0, 0, 1, 1], [], []>, precision = #tpu.contract_precision<fp32>} : vector<16x512xf32>, vector<512x32xf32>, vector<16x32xf32> -> vector<16x32xf32>
    %cst_3 = arith.constant 6.250000e-02 : f32
    %3 = vector.broadcast %cst_3 : f32 to vector<16x32xf32>
    %4 = arith.mulf %2, %3 : vector<16x32xf32>
    %c0_4 = arith.constant 0 : index
    %c0_5 = arith.constant 0 : index
    %5 = vector.load %arg2[%c0_4, %c0_5] : memref<32x4xf32, #tpu.memory_space<vmem>>, vector<32x4xf32>
    %cst_6 = arith.constant dense<0.000000e+00> : vector<16x4xf32>
    %6 = tpu.matmul %4, %5, %cst_6 {dimension_numbers = #tpu.dot_dimension_numbers<[1], [0], [0], [1], [0, 0, 1, 1], [], []>, precision = #tpu.contract_precision<fp32>} : vector<16x32xf32>, vector<32x4xf32>, vector<16x4xf32> -> vector<16x4xf32>
    %c0_7 = arith.constant 0 : index
    %c0_8 = arith.constant 0 : index
    %7 = vector.load %arg3[%c0_7, %c0_8] : memref<1x4xf32, #tpu.memory_space<vmem>>, vector<1x4xf32>
    %8 = vector.broadcast %7 : vector<1x4xf32> to vector<16x4xf32>
    %9 = arith.addf %6, %8 : vector<16x4xf32>
    %c0_9 = arith.constant 0 : index
    %10 = memref.load %arg8[%c0_9] : memref<1xf32, #tpu.memory_space<smem>>
    %cst_10 = arith.constant 0.000000e+00 : f32
    %11 = vector.broadcast %cst_10 : f32 to vector<16x4xf32>
    %12 = arith.cmpf ogt, %9, %11 : vector<16x4xf32>
    %13 = vector.broadcast %10 : f32 to vector<16x4xf32>
    %14 = arith.mulf %13, %9 : vector<16x4xf32>
    %15 = arith.select %12, %9, %14 : vector<16x4xi1>, vector<16x4xf32>
    %c0_11 = arith.constant 0 : index
    %c0_12 = arith.constant 0 : index
    %16 = vector.load %arg4[%c0_11, %c0_12] : memref<4x32xf32, #tpu.memory_space<vmem>>, vector<4x32xf32>
    %cst_13 = arith.constant dense<0.000000e+00> : vector<16x32xf32>
    %17 = tpu.matmul %15, %16, %cst_13 {dimension_numbers = #tpu.dot_dimension_numbers<[1], [0], [0], [1], [0, 0, 1, 1], [], []>, precision = #tpu.contract_precision<fp32>} : vector<16x4xf32>, vector<4x32xf32>, vector<16x32xf32> -> vector<16x32xf32>
    %c0_14 = arith.constant 0 : index
    %c0_15 = arith.constant 0 : index
    %18 = vector.load %arg5[%c0_14, %c0_15] : memref<1x32xf32, #tpu.memory_space<vmem>>, vector<1x32xf32>
    %19 = vector.broadcast %18 : vector<1x32xf32> to vector<16x32xf32>
    %20 = arith.addf %17, %19 : vector<16x32xf32>
    %21 = arith.negf %20 : vector<16x32xf32>
    %22 = math.exp %21 : vector<16x32xf32>
    %cst_16 = arith.constant 1.000000e+00 : f32
    %23 = vector.broadcast %cst_16 : f32 to vector<16x32xf32>
    %24 = arith.addf %23, %22 : vector<16x32xf32>
    %25 = arith.divf %23, %24 : vector<16x32xf32>
    %c0_17 = arith.constant 0 : index
    %c0_18 = arith.constant 0 : index
    %26 = vector.load %arg7[%c0_17, %c0_18] : memref<32x512xf32, #tpu.memory_space<vmem>>, vector<32x512xf32>
    %cst_19 = arith.constant dense<0.000000e+00> : vector<16x512xf32>
    %27 = tpu.matmul %25, %26, %cst_19 {dimension_numbers = #tpu.dot_dimension_numbers<[1], [0], [0], [1], [0, 0, 1, 1], [], []>, precision = #tpu.contract_precision<fp32>} : vector<16x32xf32>, vector<32x512xf32>, vector<16x512xf32> -> vector<16x512xf32>
    %c0_20 = arith.constant 0 : index
    %c0_21 = arith.constant 0 : index
    %28 = vector.load %arg1[%c0_20, %c0_21] : memref<16x512xf32, #tpu.memory_space<vmem>>, vector<16x512xf32>
    %29 = arith.mulf %28, %27 : vector<16x512xf32>
    %c0_22 = arith.constant 0 : index
    %c0_23 = arith.constant 0 : index
    %30 = vector.load %arg9[%c0_22, %c0_23] : memref<16x512xf32, #tpu.memory_space<vmem>>, vector<16x512xf32>
    tpu.vector_store %arg9[%c0_22, %c0_23], %29 {strides = array<i32>} : memref<16x512xf32, #tpu.memory_space<vmem>>, vector<16x512xf32>,
    return
  }
  func.func @transform_0(%arg0: i32) -> (i32, i32) {
    %c0_i32 = arith.constant 0 : i32
    %c0_i32_0 = arith.constant 0 : i32
    return %arg0, %c0_i32 : i32, i32
  }
  func.func @transform_1(%arg0: i32) -> (i32, i32) {
    %c0_i32 = arith.constant 0 : i32
    %c0_i32_0 = arith.constant 0 : i32
    %c0_i32_1 = arith.constant 0 : i32
    return %c0_i32, %c0_i32_0 : i32, i32
  }
  func.func @transform_2(%arg0: i32) -> (i32, i32) {
    %c0_i32 = arith.constant 0 : i32
    %c0_i32_0 = arith.constant 0 : i32
    %c0_i32_1 = arith.constant 0 : i32
    return %c0_i32, %c0_i32_0 : i32, i32
  }
  func.func @transform_3(%arg0: i32) -> (i32, i32) {
    %c0_i32 = arith.constant 0 : i32
    %c0_i32_0 = arith.constant 0 : i32
    %c0_i32_1 = arith.constant 0 : i32
    return %c0_i32, %c0_i32_0 : i32, i32
  }
  func.func @transform_4(%arg0: i32) -> (i32, i32) {
    %c0_i32 = arith.constant 0 : i32
    %c0_i32_0 = arith.constant 0 : i32
    %c0_i32_1 = arith.constant 0 : i32
    return %c0_i32, %c0_i32_0 : i32, i32
  }
  func.func @transform_5(%arg0: i32) -> (i32, i32) {
    %c0_i32 = arith.constant 0 : i32
    %c0_i32_0 = arith.constant 0 : i32
    %c0_i32_1 = arith.constant 0 : i32
    return %c0_i32, %c0_i32_0 : i32, i32
  }
  func.func @transform_6(%arg0: i32) -> (i32, i32) {
    %c0_i32 = arith.constant 0 : i32
    %c0_i32_0 = arith.constant 0 : i32
    %c0_i32_1 = arith.constant 0 : i32
    return %c0_i32, %c0_i32_0 : i32, i32
  }
  func.func @transform_7(%arg0: i32) -> i32 {
    %c0_i32 = arith.constant 0 : i32
    %c0_i32_0 = arith.constant 0 : i32
    return %c0_i32 : i32
  }
  func.func @transform_8(%arg0: i32) -> (i32, i32) {
    %c0_i32 = arith.constant 0 : i32
    %c0_i32_0 = arith.constant 0 : i32
    return %arg0, %c0_i32 : i32, i32
  }
}

</mosaic_0001>

<bundles_post_ra>
// kernel: tpu_custom_call.1
= control target key start
LH: loop header
LB: loop body
LE: loop exit
PB: predicated region body
PF: predicated region fallthrough
CT: control target
= control target key end

     0   :  { %s6940_s0 = inlined_call_operand.vmem [shape: f32[16,512], index: 0, kind: input, shape index: {}]   ;;  %s6941_s1 = inlined_call_operand.vmem [shape: f32[32,4], index: 1, kind: input, shape index: {}]   ;;  %s6942_s2 = inlined_call_operand.vmem [shape: f32[1,4], index: 2, kind: input, shape index: {}]   ;;  %s6943_s3 = inlined_call_operand.vmem [shape: f32[4,32], index: 3, kind: input, shape index: {}]   ;;  %s6944_s4 = inlined_call_operand.vmem [shape: f32[1,32], index: 4, kind: input, shape index: {}]   ;;  %s6945_s5 = inlined_call_operand.vmem [shape: f32[512,32], index: 5, kind: input, shape index: {}]   ;;  %s6946_s6 = inlined_call_operand.vmem [shape: f32[32,512], index: 6, kind: input, shape index: {}]   ;;  %s6947_s7 = inlined_call_operand.<no memory space> [shape: f32[1], index: 7, kind: input, shape index: {}]   ;;  %s6948_s8 = inlined_call_operand.hbm [shape: f32[16,512], index: 8, kind: output, shape index: {}]  }
   0x1   :  { %v70_v0 = vld [vmem:[%s6945_s5 + $0xf8] sm:$0xff]  ;;  %v69_v2 = vld [vmem:[%s6945_s5 + $0xf0] sm:$0xff]  ;;  %v68_v7 = vld [vmem:[%s6945_s5 + $0xe8] sm:$0xff] }
   0x2   :  { %v54_v1 = vld [vmem:[%s6945_s5 + $0x78] sm:$0xff]  ;;  %v4963_v3 = vand.u32 4294901760, %v70_v0  ;;  %v4967_v5 = vand.u32 4294901760, %v69_v2  ;;  %v53_v6 = vld [vmem:[%s6945_s5 + $0x70] sm:$0xff]  ;;  %v52_v8 = vld [vmem:[%s6945_s5 + $0x68] sm:$0xff]  ;;  %v4980_v10 = vand.u32 4294901760, %v68_v7 }
   0x3   :  { %v4965_v4 = vand.u32 4294901760, %v54_v1  ;;  %v4978_v9 = vand.u32 4294901760, %v53_v6  ;;  %v4982_v11 = vand.u32 4294901760, %v52_v8  ;;  %v67_v12 = vld [vmem:[%s6945_s5 + $0xe0] sm:$0xff]  ;;  %v66_v14 = vld [vmem:[%s6945_s5 + $0xd8] sm:$0xff]  ;;  %v5011_v20 = vld [vmem:[%s6945_s5 + $0xd0] sm:$0xff] }
   0x4   :  { %v51_v13 = vld [vmem:[%s6945_s5 + $0x60] sm:$0xff]  ;;  %4257 = vmatprep.subr.mxu0 %v4963_v3  ;;  %v4994_v15 = vand.u32 4294901760, %v67_v12  ;;  %v4998_v17 = vand.u32 4294901760, %v66_v14  ;;  %v5001_v18 = vsub.f32 %v70_v0, %v4963_v3  ;;  %v5006_v19 = vld [vmem:[%s6945_s5 + $0x58] sm:$0xff]  ;;  %v5016_v21 = vld [vmem:[%s6945_s5 + $0x50] sm:$0xff]  ;;  %v5026_v24 = vand.u32 4294901760, %v5011_v20 }
   0x5   :  { %v4996_v16 = vand.u32 4294901760, %v51_v13  ;;  %4258 = vmatpush3.msra.mxu0 %v4965_v4  ;;  %v5020_v22 = vand.u32 4294901760, %v5006_v19  ;;  %v5023_v23 = vsub.f32 %v54_v1, %v4965_v4  ;;  %v5029_v25 = vsub.f32 %v69_v2, %v4967_v5  ;;  %v5034_v26 = vld [vmem:[%s6945_s5 + $0xc8] sm:$0xff]  ;;  %v5044_v28 = vld [vmem:[%s6945_s5 + $0xc0] sm:$0xff]  ;;  %v5096_v46 = vld [vmem:[%s6945_s5 + $0xb8] sm:$0xff] }
   0x6   :  { %v5039_v27 = vld [vmem:[%s6945_s5 + $0x48] sm:$0xff]  ;;  %4259 = vmatprep.subr.mxu0 %v4967_v5  ;;  %v6962_v29 = vand.u32 4294901760, %v5001_v18  ;;  %v5049_v30 = vand.u32 4294901760, %v5016_v21  ;;  %v5052_v31 = vsub.f32 %v53_v6, %v4978_v9  ;;  %v5055_v32 = vand.u32 4294901760, %v5034_v26  ;;  %v5069_v37 = vld [vmem:[%s6945_s5 + $0x40] sm:$0xff]  ;;  %v5109_v51 = vld [vmem:[%s6945_s5 + $0x38] sm:$0xff] }
   0x7   :  { %4260 = vmatpush3.msra.mxu0 %v4978_v9  ;;  %v6961_v33 = vand.u32 4294901760, %v5023_v23  ;;  %v6959_v34 = vand.u32 4294901760, %v5029_v25  ;;  %v5061_v35 = vsub.f32 %v68_v7, %v4980_v10  ;;  %v5064_v36 = vand.u32 4294901760, %v5039_v27  ;;  %v5119_v56 = vld [vmem:[%s6945_s5 + $0xb0] sm:$0xff]  ;;  %v5149_v2 = vld [vmem:[%s6945_s5 + $0xa8] sm:$0xff] }
   0x8   :  { %7105 = vst [vmem:[#allocation6_spill] sm:$0xff] %v5049_v30  ;;  %7106 = vst [vmem:[#allocation7_spill] sm:$0xff] %v5055_v32  ;;  %4261 = vmatprep.subr.mxu0 %v4980_v10  ;;  %v346_v38 = vsub.f32 %v5001_v18, %v6962_v29  ;;  %v6958_v39 = vand.u32 4294901760, %v5052_v31  ;;  %v5077_v40 = vsub.f32 %v52_v8, %v4982_v11  ;;  %v5080_v41 = vand.u32 4294901760, %v5044_v28  ;;  %v5134_v61 = vld [vmem:[%s6945_s5 + $0x30] sm:$0xff] }
   0x9   :  { %7107 = vst [vmem:[#allocation8_spill] sm:$0xff] %v5064_v36  ;;  %4262 = vmatpush3.msra.mxu0 %v4982_v11  ;;  %v234_v42 = vsub.f32 %v5023_v23, %v6961_v33  ;;  %v353_v43 = vsub.f32 %v5029_v25, %v6959_v34  ;;  %v6956_v44 = vand.u32 4294901760, %v5061_v35  ;;  %v5091_v45 = vsub.f32 %v67_v12, %v4994_v15  ;;  %v5285_v33 = vld [vmem:[%s6945_s5 + $0x88] sm:$0xff] }
   0xa   :  { %7108 = vst [vmem:[#allocation9_spill] sm:$0xff] %v5080_v41  ;;  %4263 = vmatprep.subr.mxu0 %v4994_v15  ;;  %v347_v47 = vand.u32 4294901760, %v346_v38  ;;  %v241_v48 = vsub.f32 %v5052_v31, %v6958_v39  ;;  %v6954_v49 = vand.u32 4294901760, %v5077_v40  ;;  %v5104_v50 = vand.u32 4294901760, %v5069_v37 }
   0xb   :  { %4264 = vmatpush3.msra.mxu0 %v4996_v16  ;;  %v235_v52 = vand.u32 4294901760, %v234_v42  ;;  %v354_v53 = vand.u32 4294901760, %v353_v43  ;;  %v360_v54 = vsub.f32 %v5061_v35, %v6956_v44  ;;  %v6953_v55 = vand.u32 4294901760, %v5091_v45  ;;  %v5258_v44 = vld [vmem:[%s6945_s5 + $0x90] sm:$0xff] }
   0xc   :  { %7109 = vst [vmem:[#allocation10_spill] sm:$0xff] %v5104_v50  ;;  %4265 = vmatprep.subr.mxu0 %v4998_v17  ;;  %4295 = vmatprep.subr.mxu1 %v347_v47  ;;  %v242_v57 = vand.u32 4294901760, %v241_v48  ;;  %v248_v58 = vsub.f32 %v5077_v40, %v6954_v49  ;;  %v5126_v59 = vsub.f32 %v51_v13, %v4996_v16  ;;  %v5129_v60 = vand.u32 4294901760, %v5096_v46  ;;  %v5163_v13 = vld [vmem:[%s6945_s5 + $0x28] sm:$0xff]  ;;  %v5242_v49 = vld [vmem:[%s6945_s5 + $0x18] sm:$0xff] }
   0xd   :  { %4266 = vmatpush3.msra.mxu0 %v5020_v22  ;;  %4296 = vmatpush3.msra.mxu1 %v235_v52  ;;  %v361_v62 = vand.u32 4294901760, %v360_v54  ;;  %v367_v63 = vsub.f32 %v5091_v45, %v6953_v55  ;;  %v5141_v0 = vsub.f32 %v66_v14, %v4998_v17  ;;  %v5144_v1 = vand.u32 4294901760, %v5109_v51 }
   0xe   :  { %7110 = vst [vmem:[#allocation11_spill] sm:$0xff] %v5129_v60  ;;  %4267 = vmatprep.subr.mxu0 %v5026_v24  ;;  %4297 = vmatprep.subr.mxu1 %v354_v53  ;;  %v249_v6 = vand.u32 4294901760, %v248_v58  ;;  %v6951_v7 = vand.u32 4294901760, %v5126_v59  ;;  %v5155_v8 = vsub.f32 %v5006_v19, %v5020_v22  ;;  %v5158_v12 = vand.u32 4294901760, %v5119_v56 }
   0xf   :  { %7111 = vst [vmem:[#allocation12_spill] sm:$0xff] %v5144_v1  ;;  %4268 = vmatpush3.msra.mxu0 %v5049_v30  ;;  %4298 = vmatpush3.msra.mxu1 %v242_v57  ;;  %v368_v14 = vand.u32 4294901760, %v367_v63  ;;  %v6949_v38 = vand.u32 4294901760, %v5141_v0  ;;  %v5169_v42 = vsub.f32 %v5011_v20, %v5026_v24  ;;  %v5172_v19 = vand.u32 4294901760, %v5134_v61  ;;  %v5189_v20 = vld [vmem:[%s6945_s5 + $0xa0] sm:$0xff] }
  0x10   :  { %7112 = vst [vmem:[#allocation13_spill] sm:$0xff] %v5158_v12  ;;  %4269 = vmatprep.subr.mxu0 %v5055_v32  ;;  %4299 = vmatprep.subr.mxu1 %v361_v62  ;;  %v255_v43 = vsub.f32 %v5126_v59, %v6951_v7  ;;  %v6950_v47 = vand.u32 4294901760, %v5155_v8  ;;  %v5181_v48 = vsub.f32 %v5016_v21, %v5049_v30  ;;  %v5184_v52 = vand.u32 4294901760, %v5149_v2 }
  0x11   :  { %7113 = vst [vmem:[#allocation14_spill] sm:$0xff] %v5172_v19  ;;  %4270 = vmatpush3.msra.mxu0 %v5064_v36  ;;  %4300 = vmatpush3.msra.mxu1 %v249_v6  ;;  %v374_v53 = vsub.f32 %v5141_v0, %v6949_v38  ;;  %v6952_v54 = vand.u32 4294901760, %v5169_v42  ;;  %v5198_v21 = vsub.f32 %v5034_v26, %v5055_v32  ;;  %v5201_v57 = vand.u32 4294901760, %v5163_v13  ;;  %v5215_v26 = vld [vmem:[%s6945_s5 + $0x20] sm:$0xff] }
  0x12   :  { %7114 = vst [vmem:[#allocation15_spill] sm:$0xff] %v5184_v52  ;;  %4271 = vmatprep.subr.mxu0 %v5080_v41  ;;  %4301 = vmatprep.subr.mxu1 %v368_v14  ;;  %v256_v58 = vand.u32 4294901760, %v255_v43  ;;  %v262_v62 = vsub.f32 %v5155_v8, %v6950_v47  ;;  %v6955_v63 = vand.u32 4294901760, %v5181_v48  ;;  %v5210_v6 = vsub.f32 %v5039_v27, %v5064_v36  ;;  %v5228_v27 = vld [vmem:[%s6945_s5 + $0x98] sm:$0xff] }
  0x13   :  { %7115 = vst [vmem:[#allocation16_spill] sm:$0xff] %v5201_v57  ;;  %4272 = vmatpush3.msra.mxu0 %v5104_v50  ;;  %v375_v38 = vand.u32 4294901760, %v374_v53  ;;  %v381_v14 = vsub.f32 %v5169_v42, %v6952_v54  ;;  %v6957_v43 = vand.u32 4294901760, %v5198_v21  ;;  %v5223_v47 = vand.u32 4294901760, %v5189_v20 }
  0x14   :  { %4302 = vmatpush3.msra.mxu1 %v256_v58  ;;  %4273 = vmatprep.subr.mxu0 %v5129_v60  ;;  %v263_v7 = vand.u32 4294901760, %v262_v62  ;;  %v269_v53 = vsub.f32 %v5181_v48, %v6955_v63  ;;  %v6960_v54 = vand.u32 4294901760, %v5210_v6  ;;  %v5237_v55 = vsub.f32 %v5044_v28, %v5080_v41 }
  0x15   :  { %7116 = vst [vmem:[#allocation17_spill] sm:$0xff] %v5223_v47  ;;  %4303 = vmatprep.subr.mxu1 %v375_v38  ;;  %4274 = vmatpush3.msra.mxu0 %v5144_v1  ;;  %v382_v58 = vand.u32 4294901760, %v381_v14  ;;  %v388_v62 = vsub.f32 %v5198_v21, %v6957_v43  ;;  %v5249_v63 = vand.u32 4294901760, %v5215_v26  ;;  %v5253_v28 = vsub.f32 %v5069_v37, %v5104_v50  ;;  %v5271_v37 = vld [vmem:[%s6945_s5 + $0x10] sm:$0xff] }
  0x16   :  { %4304 = vmatpush3.msra.mxu1 %v263_v7  ;;  %4275 = vmatprep.subr.mxu0 %v5158_v12  ;;  %v270_v38 = vand.u32 4294901760, %v269_v53  ;;  %v276_v14 = vsub.f32 %v5210_v6, %v6960_v54  ;;  %v6965_v43 = vand.u32 4294901760, %v5237_v55  ;;  %v5266_v39 = vand.u32 4294901760, %v5228_v27 }
  0x17   :  { %7117 = vst [vmem:[#allocation18_spill] sm:$0xff] %v5249_v63  ;;  %4305 = vmatprep.subr.mxu1 %v382_v58  ;;  %4276 = vmatpush3.msra.mxu0 %v5172_v19  ;;  %v389_v7 = vand.u32 4294901760, %v388_v62  ;;  %v6966_v53 = vand.u32 4294901760, %v5253_v28  ;;  %v5277_v34 = vsub.f32 %v5096_v46, %v5129_v60  ;;  %v5280_v54 = vand.u32 4294901760, %v5242_v49 }
  0x18   :  { %7118 = vst [vmem:[#allocation19_spill] sm:$0xff] %v5266_v39  ;;  %4306 = vmatpush3.msra.mxu1 %v270_v38  ;;  %4277 = vmatprep.subr.mxu0 %v5184_v52  ;;  %v277_v58 = vand.u32 4294901760, %v276_v14  ;;  %v395_v62 = vsub.f32 %v5237_v55, %v6965_v43  ;;  %v5293_v46 = vsub.f32 %v5109_v51, %v5144_v1  ;;  %v5296_v29 = vand.u32 4294901760, %v5258_v44  ;;  %v5313_v51 = vld [vmem:[%s6945_s5 + $0x8] sm:$0xff] }
  0x19   :  { %7119 = vst [vmem:[#allocation20_spill] sm:$0xff] %v5280_v54  ;;  %4307 = vmatprep.subr.mxu1 %v389_v7  ;;  %4278 = vmatpush3.msra.mxu0 %v5201_v57  ;;  %v283_v38 = vsub.f32 %v5253_v28, %v6966_v53  ;;  %v5305_v60 = vsub.f32 %v5119_v56, %v5158_v12  ;;  %v5308_v43 = vand.u32 4294901760, %v5271_v37 }
  0x1a   :  { %7120 = vst [vmem:[#allocation21_spill] sm:$0xff] %v5296_v29 }
  0x1b   :  { %7121 = vst [vmem:[#allocation22_spill] sm:$0xff] %v5308_v43 }
  0x1c   :  { %14 = vsyncpa [#allocation4], 0  ;;  %4308 = vmatpush3.msra.mxu1 %v277_v58  ;;  %4279 = vmatprep.subr.mxu0 %v5223_v47  ;;  %v396_v7 = vand.u32 4294901760, %v395_v62  ;;  %v5319_v14 = vsub.f32 %v5134_v61, %v5172_v19  ;;  %v5322_v56 = vand.u32 4294901760, %v5285_v33  ;;  %v5327_v12 = vld [vmem:[%s6945_s5 + $0x80] sm:$0xff]  ;;  %v284_v58 = vand.u32 4294901760, %v283_v38 }
  0x1d   :  { %4280 = vmatpush3.msra.mxu0 %v5249_v63  ;;  %v7124_v1 = vand.u32 4294901760, %v5277_v34  ;;  %v6983_v53 = vand.u32 4294901760, %v5305_v60  ;;  %v5336_v61 = vsub.f32 %v5149_v2, %v5184_v52  ;;  %v7126_v19 = vand.u32 4294901760, %v5293_v46  ;;  %v5353_v2 = vld [vmem:[%s6945_s5] sm:$0xff]  ;;  %s4906_s20 = smov [#allocation3]  }
  0x1e   :  { %7122 = vst [vmem:[#allocation23_spill] sm:$0xff] %v5319_v14  ;;  %7123 = vst [vmem:[#allocation24_spill] sm:$0xff] %v5322_v56  ;;  %4309 = vmatprep.subr.mxu1 %v396_v7  ;;  %4281 = vmatprep.subr.mxu0 %v5266_v39  ;;  %v5344_v38 = vand.u32 4294901760, %v5313_v51  ;;  %v5361_v52 = vand.u32 4294901760, %v5327_v12  ;;  %v31_v41 = vld [vmem:[%s6940_s0] sm:$0xff]  ;;  %v5387_v36 = vsub.f32 %v5215_v26, %v5249_v63  ;;  %vm1952_vm0 = vcmask 261120  }
  0x1f   :  { %v402_v62 = vsub.f32 %v5277_v34, %v7124_v1  ;;  %7125 = vst [vmem:[#allocation25_spill] sm:$0xff] %v5336_v61  ;;  %v290_v50 = vsub.f32 %v5293_v46, %v7126_v19  ;;  %v5348_v1 = vsub.f32 %v5163_v13, %v5201_v57  ;;  %4310 = vmatpush3.msra.mxu1 %v284_v58  ;;  %v32_v13 = vld [vmem:[%s6940_s0 + $0x8] sm:$0xff]  ;;  %v7128_v58 = vand.u32 4294901760, %v5319_v14 }
  0x20   :  { %4282 = vmatpush3.msra.mxu0 %v5280_v54  ;;  %v409_v19 = vsub.f32 %v5305_v60, %v6983_v53  ;;  %v5373_v53 = vsub.f32 %v5189_v20, %v5223_v47  ;;  %7130 = vst [vmem:[#allocation27_spill] sm:$0xff] %v5387_v36  ;;  %v5402_v26 = vand.u32 4294901760, %v31_v41  ;;  %vm2510_vm1 = vcmask 1043456  }
  0x21   :  { %7127 = vst [vmem:[#allocation26_spill] sm:$0xff] %v5348_v1  ;;  %v403_v7 = vand.u32 4294901760, %v402_v62  ;;  %v291_v57 = vand.u32 4294901760, %v290_v50  ;;  %4283 = vmatprep.subr.mxu0 %v5296_v29  ;;  %v297_v62 = vsub.f32 %v5319_v14, %v7128_v58  ;;  %v7129_v50 = vand.u32 4294901760, %v5336_v61 }
  0x22   :  { %v410_v32 = vand.u32 4294901760, %v409_v19  ;;  %4284 = vmatpush3.msra.mxu0 %v5308_v43  ;;  %v5383_v58 = vand.u32 4294901760, %v5353_v2  ;;  %v6994_v47 = vand.u32 4294901760, %v5373_v53  ;;  %v5394_v14 = vand.u32 4294901760, %v32_v13  ;;  %7133 = vst [vmem:[#allocation29_spill] sm:$0xff] %v5402_v26 }
  0x23   :  { %4311 = vmatprep.subr.mxu1 %v403_v7  ;;  %v416_v30 = vsub.f32 %v5336_v61, %v7129_v50  ;;  %v298_v20 = vand.u32 4294901760, %v297_v62  ;;  %4285 = vmatprep.subr.mxu0 %v5322_v56  ;;  %v7131_v7 = vand.u32 4294901760, %v5348_v1  ;;  %v6995_v61 = vand.u32 4294901760, %v5387_v36 }
  0x24   :  { %4312 = vmatpush3.msra.mxu1 %v291_v57  ;;  %7132 = vst [vmem:[#allocation28_spill] sm:$0xff] %v5394_v14  ;;  %4286 = vmatpush3.msra.mxu0 %v5344_v38  ;;  %v5400_v57 = vsub.f32 %v5228_v27, %v5266_v39  ;;  %vm2503_vm3 = vcmask 31744  }
  0x25   :  { %v304_v19 = vsub.f32 %v5348_v1, %v7131_v7  ;;  %4313 = vmatprep.subr.mxu1 %v410_v32  ;;  %v417_v50 = vand.u32 4294901760, %v416_v30  ;;  %4287 = vmatprep.subr.mxu0 %v5361_v52  ;;  %v423_v7 = vsub.f32 %v5373_v53, %v6994_v47  ;;  %v5409_v30 = vsub.f32 %v32_v13, %v5394_v14 }
  0x26   :  { %4314 = vmatpush3.msra.mxu1 %v298_v20  ;;  %v5413_v32 = vsub.f32 %v5242_v49, %v5280_v54  ;;  %4288 = vmatpush3.msra.mxu0 %v5383_v58  ;;  %v311_v27 = vsub.f32 %v5387_v36, %v6995_v61  ;;  %v5425_v13 = vsub.f32 %v5258_v44, %v5296_v29 }
  0x27   :  { %v305_v62 = vand.u32 4294901760, %v304_v19  ;;  %4315 = vmatprep.subr.mxu1 %v417_v50  ;;  %v5421_v19 = vsub.f32 %v31_v41, %v5402_v26  ;;  %v424_v47 = vand.u32 4294901760, %v423_v7  ;;  %v7000_v49 = vand.u32 4294901760, %v5409_v30  ;;  %4333 = vmatprep.subr.mxu0 %v5001_v18 }
  0x28   :  { %7134 = vst [vmem:[#allocation30_spill] sm:$0xff] %v5413_v32  ;;  %v7003_v50 = vand.u32 4294901760, %v5413_v32  ;;  %v5432_v61 = vsub.f32 %v5271_v37, %v5308_v43  ;;  %v312_v20 = vand.u32 4294901760, %v311_v27  ;;  %v7135_v41 = vand.u32 4294901760, %v5400_v57  ;;  %455 = vmatprep.mubr.f32.mxu1 %v5394_v14 }
  0x29   :  { %4316 = vmatpush3.msra.mxu1 %v305_v62  ;;  %v202_v7 = vsub.f32 %v5409_v30, %v7000_v49  ;;  %v7136_v62 = vand.u32 4294901760, %v5421_v19  ;;  %v7137_v14 = vand.u32 4294901760, %v5425_v13  ;;  %v5459_v43 = vsub.f32 %v5313_v51, %v5344_v38 }
  0x2a   :  { %v430_v54 = vsub.f32 %v5400_v57, %v7135_v41  ;;  %4317 = vmatprep.subr.mxu1 %v424_v47  ;;  %v318_v37 = vsub.f32 %v5413_v32, %v7003_v50  ;;  %v5449_v41 = vsub.f32 %v5285_v33, %v5322_v56  ;;  %v7138_v29 = vand.u32 4294901760, %v5432_v61 }
  0x2b   :  { %4318 = vmatpush3.msra.mxu1 %v312_v20  ;;  %v208_v47 = vsub.f32 %v5421_v19, %v7136_v62  ;;  %v437_v49 = vsub.f32 %v5425_v13, %v7137_v14  ;;  %v203_v50 = vand.u32 4294901760, %v202_v7  ;;  %v7010_v62 = vand.u32 4294901760, %v5459_v43 }
  0x2c   :  { %v431_v44 = vand.u32 4294901760, %v430_v54  ;;  %v319_v27 = vand.u32 4294901760, %v318_v37  ;;  %v325_v33 = vsub.f32 %v5432_v61, %v7138_v29  ;;  %v7011_v54 = vand.u32 4294901760, %v5449_v41 }
  0x2d   :  { %v209_v20 = vand.u32 4294901760, %v208_v47  ;;  %v438_v56 = vand.u32 4294901760, %v437_v49  ;;  %v5468_v14 = vsub.f32 %v5327_v12, %v5361_v52  ;;  %204 = vmatprep.mubr.f32.mxu0 %v203_v50  ;;  %v5475_v29 = vsub.f32 %v5353_v2, %v5383_v58  ;;  %v36_v47 = vld [vmem:[%s6940_s0 + $0x28] sm:$0xff] }
  0x2e   :  { %4319 = vmatprep.subr.mxu1 %v431_v44  ;;  %v326_v51 = vand.u32 4294901760, %v325_v33  ;;  %v444_v7 = vsub.f32 %v5449_v41, %v7011_v54  ;;  %v332_v49 = vsub.f32 %v5459_v43, %v7010_v62  ;;  %v7146_v62 = vld [vmem:[#allocation9_spill] sm:$0xff] }
  0x2f   :  { %4320 = vmatpush3.msra.mxu1 %v319_v27  ;;  %7139 = vst [vmem:[#allocation31_spill] sm:$0xff] %v5475_v29  ;;  %210 = vmatmul.mubr.f32.vlgmr.msra.gmra.mxu0 %v209_v20  ;;  %v7009_v12 = vand.u32 4294901760, %v5468_v14  ;;  %v7008_v44 = vand.u32 4294901760, %v5475_v29  ;;  %v35_v20 = vld [vmem:[%s6940_s0 + $0x20] sm:$0xff] }
  0x30   :  { %4321 = vmatprep.subr.mxu1 %v438_v56  ;;  %4334 = vmatpush3.msra.mxu0 %v5023_v23  ;;  %v445_v50 = vand.u32 4294901760, %v444_v7  ;;  %v333_v37 = vand.u32 4294901760, %v332_v49  ;;  %v5507_v7 = vand.u32 4294901760, %v35_v20 }
  0x31   :  { %4322 = vmatpush3.msra.mxu1 %v326_v51  ;;  %4335 = vmatprep.subr.mxu0 %v5029_v25  ;;  %v451_v2 = vsub.f32 %v5468_v14, %v7009_v12  ;;  %v339_v56 = vsub.f32 %v5475_v29, %v7008_v44  ;;  %v5501_v51 = vand.u32 4294901760, %v36_v47  ;;  %v7145_v12 = vld [vmem:[#allocation8_spill] sm:$0xff] }
  0x32   :  { %4336 = vmatpush3.msra.mxu0 %v5052_v31  ;;  %4323 = vmatprep.subr.mxu1 %v445_v50  ;;  %v5521_v50 = vsub.f32 %v35_v20, %v5507_v7  ;;  %v7144_v20 = vld [vmem:[#allocation7_spill] sm:$0xff] }
  0x33   :  { %4337 = vmatprep.subr.mxu0 %v5061_v35  ;;  %4324 = vmatpush3.msra.mxu1 %v333_v37  ;;  %v452_v27 = vand.u32 4294901760, %v451_v2  ;;  %v340_v33 = vand.u32 4294901760, %v339_v56  ;;  %7140 = vst [vmem:[#allocation32_spill] sm:$0xff] %v5501_v51  ;;  %v5514_v49 = vsub.f32 %v36_v47, %v5501_v51  ;;  %v7141_v56 = vld [vmem:[#allocation23_spill] sm:$0xff]  ;;  %v7142_v47 = vld [vmem:[#allocation6_spill] sm:$0xff] }
  0x34   :  { %4338 = vmatpush3.msra.mxu0 %v5077_v40  ;;  %v7016_v2 = vand.u32 4294901760, %v5521_v50 }
  0x35   :  { %4325 = vmatprep.subr.mxu1 %v452_v27  ;;  %4339 = vmatprep.subr.mxu0 %v5091_v45  ;;  %v7012_v37 = vand.u32 4294901760, %v5514_v49 }
  0x36   :  { %4326 = vmatpush3.msra.mxu1 %v340_v33  ;;  %4340 = vmatpush3.msra.mxu0 %v5126_v59  ;;  %v7143_v33 = vld [vmem:[#allocation25_spill] sm:$0xff]  ;;  %v223_v44 = vsub.f32 %v5521_v50, %v7016_v2 }
  0x37   :  { %457 = vmatmul.mubr.f32.vlgmr.msra.gmra.mxu1 %v5402_v26  ;;  %4341 = vmatprep.subr.mxu0 %v5141_v0  ;;  %v217_v27 = vsub.f32 %v5514_v49, %v7012_v37  ;;  %v7147_v37 = vld [vmem:[#allocation10_spill] sm:$0xff]  ;;  %v7148_v26 = vld [vmem:[#allocation11_spill] sm:$0xff]  ;;  %v7150_v2 = vld [vmem:[#allocation13_spill] sm:$0xff] }
  0x38   :  { %4371 = vmatprep.subr.mxu1 %v4963_v3  ;;  %4342 = vmatpush3.msra.mxu0 %v5155_v8 }
  0x39   :  { %4372 = vmatpush3.msra.mxu1 %v4965_v4  ;;  %4343 = vmatprep.subr.mxu0 %v5169_v42  ;;  %v218_v54 = vand.u32 4294901760, %v217_v27  ;;  %v7152_v27 = vld [vmem:[#allocation15_spill] sm:$0xff] }
  0x3a   :  { %4373 = vmatprep.subr.mxu1 %v4967_v5  ;;  %4344 = vmatpush3.msra.mxu0 %v5181_v48 }
  0x3b   :  { %4374 = vmatpush3.msra.mxu1 %v4978_v9  ;;  %4345 = vmatprep.subr.mxu0 %v5198_v21 }
  0x3c   :  { %4375 = vmatprep.subr.mxu1 %v4980_v10  ;;  %4346 = vmatpush3.msra.mxu0 %v5210_v6 }
  0x3d   :  { %4376 = vmatpush3.msra.mxu1 %v4982_v11  ;;  %4347 = vmatprep.subr.mxu0 %v5237_v55 }
  0x3e   :  { %4377 = vmatprep.subr.mxu1 %v4994_v15  ;;  %4348 = vmatpush3.msra.mxu0 %v5253_v28 }
  0x3f   :  { %4378 = vmatpush3.msra.mxu1 %v4996_v16  ;;  %4349 = vmatprep.subr.mxu0 %v5277_v34 }
  0x40   :  { %4379 = vmatprep.subr.mxu1 %v4998_v17  ;;  %4350 = vmatpush3.msra.mxu0 %v5293_v46 }
  0x41   :  { %4380 = vmatpush3.msra.mxu1 %v5020_v22  ;;  %4351 = vmatprep.subr.mxu0 %v5305_v60 }
  0x42   :  { %4381 = vmatprep.subr.mxu1 %v5026_v24  ;;  %4352 = vmatpush3.msra.mxu0 %v7141_v56 }
  0x43   :  { %4382 = vmatpush3.msra.mxu1 %v7142_v47  ;;  %4353 = vmatprep.subr.mxu0 %v7143_v33 }
  0x44   :  { %4383 = vmatprep.subr.mxu1 %v7144_v20  ;;  %4354 = vmatpush3.msra.mxu0 %v5348_v1  ;;  %v224_v1 = vand.u32 4294901760, %v223_v44  ;;  %v7149_v20 = vld [vmem:[#allocation12_spill] sm:$0xff]  ;;  %v7154_v44 = vld [vmem:[#allocation17_spill] sm:$0xff] }
  0x45   :  { %4384 = vmatpush3.msra.mxu1 %v7145_v12  ;;  %4355 = vmatprep.subr.mxu0 %v5373_v53 }
  0x46   :  { %4385 = vmatprep.subr.mxu1 %v7146_v62  ;;  %4356 = vmatpush3.msra.mxu0 %v5387_v36  ;;  %v7151_v36 = vld [vmem:[#allocation14_spill] sm:$0xff] }
  0x47   :  { %4386 = vmatpush3.msra.mxu1 %v7147_v37  ;;  %4357 = vmatprep.subr.mxu0 %v5400_v57 }
  0x48   :  { %4387 = vmatprep.subr.mxu1 %v7148_v26  ;;  %4358 = vmatpush3.msra.mxu0 %v5413_v32  ;;  %v7153_v32 = vld [vmem:[#allocation16_spill] sm:$0xff] }
  0x49   :  { %4388 = vmatpush3.msra.mxu1 %v7149_v20  ;;  %4359 = vmatprep.subr.mxu0 %v5425_v13 }
  0x4a   :  { %4389 = vmatprep.subr.mxu1 %v7150_v2  ;;  %219 = vmatprep.mubr.f32.mxu0 %v218_v54  ;;  %v7156_v54 = vand.u32 4294901760, %v5023_v23  ;;  %v7163_v23 = vand.u32 4294901760, %v5061_v35  ;;  %v7168_v35 = vand.u32 4294901760, %v5421_v19 }
  0x4b   :  { %4360 = vmatpush3.msra.mxu0 %v5432_v61  ;;  %4390 = vmatpush3.msra.mxu1 %v7151_v36 }
  0x4c   :  { %225 = vmatmul.mubr.f32.gmra.mxu0 %v224_v1  ;;  %4361 = vmatprep.subr.mxu0 %v5449_v41  ;;  %v7155_v1 = vand.u32 4294901760, %v5001_v18  ;;  %v7162_v18 = vld [vmem:[#allocation24_spill] sm:$0xff] }
  0x4d   :  { %4391 = vmatprep.subr.mxu1 %v7152_v27  ;;  %4362 = vmatpush3.msra.mxu0 %v5459_v43 }
  0x4e   :  { %4392 = vmatpush3.msra.mxu1 %v7153_v32  ;;  %4363 = vmatprep.subr.mxu0 %v5468_v14 }
  0x4f   :  { %4393 = vmatprep.subr.mxu1 %v7154_v44  ;;  %4364 = vmatpush3.msra.mxu0 %v5475_v29  ;;  %v7157_v44 = vld [vmem:[#allocation20_spill] sm:$0xff]  ;;  %v7158_v29 = vand.u32 4294901760, %v5029_v25  ;;  %v7164_v25 = vand.u32 4294901760, %v5077_v40  ;;  %v7170_v40 = vand.u32 4294901760, %v5155_v8  ;;  %v7177_v8 = vand.u32 4294901760, %v5237_v55 }
  0x50   :  { %599 = vmatprep.mubr.f32.mxu0 %v5409_v30  ;;  %4394 = vmatpush3.msra.mxu1 %v5249_v63  ;;  %v7159_v63 = vld [vmem:[#allocation21_spill] sm:$0xff]  ;;  %v85_v55 = vld [vmem:[%s6945_s5 + $0x170] sm:$0xff] }
  0x51   :  { %462 = vmatprep.mubr.f32.mxu1 %v5501_v51  ;;  %602 = vmatmul.mubr.f32.vlgmr.msra.gmra.mxu0 %v5421_v19  ;;  %v7160_v51 = vld [vmem:[#allocation22_spill] sm:$0xff] }
  0x52   :  { %4395 = vmatprep.subr.mxu1 %v5266_v39  ;;  %4409 = vmatprep.subr.mxu0 %v7155_v1  ;;  %v7161_v39 = vand.u32 4294901760, %v5052_v31  ;;  %v7166_v31 = vand.u32 4294901760, %v5409_v30  ;;  %v7169_v1 = vand.u32 4294901760, %v5141_v0  ;;  %v7173_v30 = vand.u32 4294901760, %v5181_v48  ;;  %v7186_v19 = vld [vmem:[#allocation26_spill] sm:$0xff] }
  0x53   :  { %464 = vmatmul.mubr.f32.gmra.mxu1 %v5507_v7  ;;  %4410 = vmatpush3.msra.mxu0 %v7156_v54  ;;  %v7175_v0 = vand.u32 4294901760, %v5198_v21  ;;  %v7182_v21 = vand.u32 4294901760, %v7141_v56  ;;  %v7189_v56 = vand.u32 4294901760, %v5373_v53  ;;  %v83_v54 = vld [vmem:[%s6945_s5 + $0x160] sm:$0xff]  ;;  %v7193_v53 = vand.u32 4294901760, %v5400_v57 }
  0x54   :  { %4396 = vmatpush3.msra.mxu1 %v7157_v44  ;;  %4411 = vmatprep.subr.mxu0 %v7158_v29  ;;  %v7165_v29 = vand.u32 4294901760, %v5091_v45  ;;  %v7171_v45 = vand.u32 4294901760, %v5169_v42  ;;  %v7179_v42 = vand.u32 4294901760, %v5277_v34  ;;  %v5713_v57 = vand.u32 4294901760, %v83_v54 }
  0x55   :  { %4397 = vmatprep.subr.mxu1 %v7159_v63  ;;  %608 = vmatprep.mubr.f32.mxu0 %v5514_v49 }
  0x56   :  { %4398 = vmatpush3.msra.mxu1 %v7160_v51  ;;  %4412 = vmatpush3.msra.mxu0 %v7161_v39  ;;  %v7167_v39 = vand.u32 4294901760, %v5126_v59  ;;  %v7172_v59 = vand.u32 4294901760, %v5514_v49  ;;  %v7187_v49 = vand.u32 4294901760, %v7186_v19  ;;  %7197 = vst [vmem:[#allocation9_spill] sm:$0xff] %v5713_v57  ;;  %v7212_v19 = vld [vmem:[#allocation28_spill] sm:$0xff] }
  0x57   :  { %611 = vmatmul.mubr.f32.gmra.mxu0 %v5521_v50  ;;  %4399 = vmatprep.subr.mxu1 %v7162_v18 }
  0x58   :  { %4413 = vmatprep.subr.mxu0 %v7163_v23  ;;  %4400 = vmatpush3.msra.mxu1 %v5344_v38 }
  0x59   :  { %4414 = vmatpush3.msra.mxu0 %v7164_v25  ;;  %4401 = vmatprep.subr.mxu1 %v5361_v52  ;;  %v7191_v25 = vld [vmem:[#allocation27_spill] sm:$0xff] }
  0x5a   :  { %4415 = vmatprep.subr.mxu0 %v7165_v29  ;;  %4402 = vmatpush3.msra.mxu1 %v5383_v58 }
  0x5b   :  { %715 = vmatprep.mubr.f32.mxu1 %v7166_v31  ;;  %4416 = vmatpush3.msra.mxu0 %v7167_v39  ;;  %v82_v31 = vld [vmem:[%s6945_s5 + $0x158] sm:$0xff] }
  0x5c   :  { %719 = vmatmul.mubr.f32.vlgmr.msra.gmra.mxu1 %v7168_v35  ;;  %4417 = vmatprep.subr.mxu0 %v7169_v1 }
  0x5d   :  { %4447 = vmatprep.subr.mxu1 %v4963_v3  ;;  %4418 = vmatpush3.msra.mxu0 %v7170_v40  ;;  %v7174_v3 = vand.u32 4294901760, %v5521_v50  ;;  %v98_v40 = vld [vmem:[%s6945_s5 + $0x1d8] sm:$0xff] }
  0x5e   :  { %4448 = vmatpush3.msra.mxu1 %v4965_v4  ;;  %4419 = vmatprep.subr.mxu0 %v7171_v45  ;;  %v7176_v4 = vand.u32 4294901760, %v5210_v6  ;;  %v84_v6 = vld [vmem:[%s6945_s5 + $0x168] sm:$0xff] }
  0x5f   :  { %4449 = vmatprep.subr.mxu1 %v4967_v5  ;;  %726 = vmatprep.mubr.f32.mxu1 %v7172_v59  ;;  %v86_v5 = vld [vmem:[%s6945_s5 + $0x178] sm:$0xff]  ;;  %v7198_v59 = vand.u32 4294901760, %v5425_v13  ;;  %v97_v13 = vld [vmem:[%s6945_s5 + $0x1d0] sm:$0xff] }
  0x60   :  { %4420 = vmatpush3.msra.mxu0 %v7173_v30  ;;  %4450 = vmatpush3.msra.mxu1 %v4978_v9  ;;  %v7178_v9 = vand.u32 4294901760, %v5253_v28  ;;  %v5638_v48 = vand.u32 4294901760, %v86_v5 }
  0x61   :  { %730 = vmatmul.mubr.f32.gmra.mxu1 %v7174_v3  ;;  %4421 = vmatprep.subr.mxu0 %v7175_v0  ;;  %v81_v3 = vld [vmem:[%s6945_s5 + $0x150] sm:$0xff]  ;;  %v7199_v0 = vand.u32 4294901760, %v5432_v61 }
  0x62   :  { %4451 = vmatprep.subr.mxu1 %v4980_v10  ;;  %4422 = vmatpush3.msra.mxu0 %v7176_v4  ;;  %v102_v10 = vld [vmem:[%s6945_s5 + $0x1f8] sm:$0xff]  ;;  %v5734_v4 = vand.u32 4294901760, %v82_v31 }
  0x63   :  { %4452 = vmatpush3.msra.mxu1 %v4982_v11  ;;  %4423 = vmatprep.subr.mxu0 %v7177_v8  ;;  %v7180_v11 = vand.u32 4294901760, %v5293_v46  ;;  %v5652_v34 = vand.u32 4294901760, %v102_v10  ;;  %v5671_v46 = vand.u32 4294901760, %v85_v55 }
  0x64   :  { %4453 = vmatprep.subr.mxu1 %v4994_v15  ;;  %4424 = vmatpush3.msra.mxu0 %v7178_v9  ;;  %v101_v15 = vld [vmem:[%s6945_s5 + $0x1f0] sm:$0xff]  ;;  %7200 = vst [vmem:[#allocation10_spill] sm:$0xff] %v5734_v4  ;;  %v96_v9 = vld [vmem:[%s6945_s5 + $0x1c8] sm:$0xff] }
  0x65   :  { %4454 = vmatpush3.msra.mxu1 %v4996_v16  ;;  %4425 = vmatprep.subr.mxu0 %v7179_v42  ;;  %v7181_v16 = vand.u32 4294901760, %v5305_v60  ;;  %v5667_v60 = vsub.f32 %v86_v5, %v5638_v48  ;;  %v5669_v28 = vand.u32 4294901760, %v101_v15  ;;  %7184 = vst [vmem:[#allocation23_spill] sm:$0xff] %v5671_v46  ;;  %v5690_v23 = vsub.f32 %v102_v10, %v5652_v34 }
  0x66   :  { %4455 = vmatprep.subr.mxu1 %v4998_v17  ;;  %4426 = vmatpush3.msra.mxu0 %v7180_v11  ;;  %v100_v17 = vld [vmem:[%s6945_s5 + $0x1e8] sm:$0xff]  ;;  %v5699_v29 = vsub.f32 %v85_v55, %v5671_v46  ;;  %v5742_v5 = vand.u32 4294901760, %v98_v40  ;;  %v5761_v10 = vsub.f32 %v83_v54, %v5713_v57  ;;  %v5763_v42 = vand.u32 4294901760, %v81_v3 }
  0x67   :  { %4456 = vmatpush3.msra.mxu1 %v5020_v22  ;;  %4427 = vmatprep.subr.mxu0 %v7181_v16  ;;  %v7183_v22 = vand.u32 4294901760, %v7143_v33  ;;  %v5676_v50 = vand.u32 4294901760, %v100_v17  ;;  %v99_v33 = vld [vmem:[%s6945_s5 + $0x1e0] sm:$0xff]  ;;  %v7028_v39 = vand.u32 4294901760, %v5667_v60  ;;  %v5706_v35 = vsub.f32 %v101_v15, %v5669_v28 }
  0x68   :  { %4457 = vmatprep.subr.mxu1 %v5026_v24  ;;  %4428 = vmatpush3.msra.mxu0 %v7182_v21  ;;  %v7185_v24 = vld [vmem:[#allocation7_spill] sm:$0xff]  ;;  %v7030_v30 = vand.u32 4294901760, %v5690_v23  ;;  %7202 = vst [vmem:[#allocation11_spill] sm:$0xff] %v5742_v5  ;;  %v7026_v8 = vand.u32 4294901760, %v5699_v29  ;;  %7204 = vst [vmem:[#allocation12_spill] sm:$0xff] %v5763_v42  ;;  %v7205_v55 = vand.u32 4294901760, %v5468_v14 }
  0x69   :  { %4458 = vmatpush3.msra.mxu1 %v7142_v47  ;;  %4429 = vmatprep.subr.mxu0 %v7183_v22  ;;  %7188 = vst [vmem:[#allocation6_spill] sm:$0xff] %v5676_v50  ;;  %v5681_v47 = vand.u32 4294901760, %v84_v6  ;;  %v5719_v45 = vsub.f32 %v100_v17, %v5676_v50  ;;  %v7027_v61 = vand.u32 4294901760, %v5706_v35  ;;  %v7207_v17 = vld [vmem:[#allocation17_spill] sm:$0xff]  ;;  %v7208_v21 = vld [vmem:[#allocation31_spill] sm:$0xff]  ;;  %v5784_v22 = vsub.f32 %v82_v31, %v5734_v4 }
  0x6a   :  { %4459 = vmatprep.subr.mxu1 %v7185_v24  ;;  %4430 = vmatpush3.msra.mxu0 %v7187_v49  ;;  %v95_v24 = vld [vmem:[%s6945_s5 + $0x1c0] sm:$0xff]  ;;  %v5804_v54 = vsub.f32 %v5699_v29, %v7026_v8  ;;  %v7214_v31 = vld [vmem:[#allocation29_spill] sm:$0xff] }
  0x6b   :  { %4460 = vmatpush3.msra.mxu1 %v7145_v12  ;;  %4431 = vmatprep.subr.mxu0 %v7189_v56  ;;  %7190 = vst [vmem:[#allocation25_spill] sm:$0xff] %v5681_v47  ;;  %v7192_v12 = vand.u32 4294901760, %v7191_v25  ;;  %v7025_v11 = vand.u32 4294901760, %v5719_v45  ;;  %v7213_v49 = vld [vmem:[#allocation18_spill] sm:$0xff] }
  0x6c   :  { %4461 = vmatprep.subr.mxu1 %v7146_v62  ;;  %v7194_v62 = vld [vmem:[#allocation30_spill] sm:$0xff]  ;;  %896 = vmatprep.mubr.f32.mxu0 %v7212_v19 }
  0x6d   :  { %4432 = vmatpush3.msra.mxu0 %v7192_v12  ;;  %4462 = vmatpush3.msra.mxu1 %v7147_v37  ;;  %v7195_v1 = vand.u32 4294901760, %v7194_v62  ;;  %v5711_v37 = vand.u32 4294901760, %v99_v33  ;;  %v79_v25 = vld [vmem:[%s6945_s5 + $0x140] sm:$0xff]  ;;  %v5810_v12 = vsub.f32 %v98_v40, %v5742_v5  ;;  %v7215_v62 = vld [vmem:[#allocation19_spill] sm:$0xff]  ;;  %v7031_v40 = vand.u32 4294901760, %v5761_v10 }
  0x6e   :  { %4433 = vmatprep.subr.mxu0 %v7193_v53  ;;  %4463 = vmatprep.subr.mxu1 %v7148_v26  ;;  %v5725_v26 = vsub.f32 %v84_v6, %v5681_v47  ;;  %v7209_v6 = vand.u32 4294901760, %v7208_v21  ;;  %v78_v53 = vld [vmem:[%s6945_s5 + $0x138] sm:$0xff]  ;;  %v5848_v21 = vand.u32 4294901760, %v79_v25 }
  0x6f   :  { %4434 = vmatpush3.msra.mxu0 %v7195_v1  ;;  %7196 = vst [vmem:[#allocation8_spill] sm:$0xff] %v5711_v37  ;;  %4464 = vmatpush3.msra.mxu1 %v7149_v20  ;;  %v7201_v20 = vand.u32 4294901760, %v5449_v41  ;;  %v7203_v41 = vand.u32 4294901760, %v5459_v43  ;;  %v5767_v15 = vsub.f32 %v99_v33, %v5711_v37  ;;  %v5775_v43 = vsub.f32 %v5690_v23, %v7030_v30 }
  0x70   :  { %4435 = vmatprep.subr.mxu0 %v7198_v59  ;;  %4465 = vmatprep.subr.mxu1 %v7150_v2  ;;  %v5747_v2 = vsub.f32 %v5667_v60, %v7028_v39  ;;  %v7024_v16 = vand.u32 4294901760, %v5725_v26  ;;  %v5799_v33 = vsub.f32 %v5706_v35, %v7027_v61  ;;  %v5818_v1 = vsub.f32 %v81_v3, %v5763_v42 }
  0x71   :  { %4436 = vmatpush3.msra.mxu0 %v7199_v0  ;;  %4466 = vmatpush3.msra.mxu1 %v7151_v36  ;;  %v80_v36 = vld [vmem:[%s6945_s5 + $0x148] sm:$0xff]  ;;  %v5823_v59 = vsub.f32 %v5719_v45, %v7025_v11  ;;  %v7029_v0 = vand.u32 4294901760, %v5767_v15  ;;  %7219 = vst [vmem:[#allocation22_spill] sm:$0xff] %v5848_v21  ;;  %v7033_v11 = vand.u32 4294901760, %v5810_v12  ;;  %v5872_v61 = vsub.f32 %v5761_v10, %v7031_v40 }
  0x72   :  { %4437 = vmatprep.subr.mxu0 %v7201_v20  ;;  %4467 = vmatprep.subr.mxu1 %v7152_v27  ;;  %v5777_v27 = vand.u32 4294901760, %v97_v13  ;;  %v5788_v14 = vand.u32 4294901760, %v80_v36  ;;  %7216 = vst [vmem:[#allocation16_spill] sm:$0xff] %v5818_v1  ;;  %v5833_v3 = vsub.f32 %v5725_v26, %v7024_v16  ;;  %v76_v16 = vld [vmem:[%s6945_s5 + $0x128] sm:$0xff]  ;;  %v5951_v20 = vld [vmem:[%s6945_s5 + $0x1a0] sm:$0xff] }
  0x73   :  { %4438 = vmatpush3.msra.mxu0 %v7203_v41  ;;  %4468 = vmatpush3.msra.mxu1 %v7153_v32  ;;  %v5786_v32 = vand.u32 4294901760, %v96_v9  ;;  %v5835_v41 = vand.u32 4294901760, %v95_v24  ;;  %v5867_v8 = vsub.f32 %v5767_v15, %v7029_v0  ;;  %v5934_v40 = vand.u32 4294901760, %v76_v16 }
  0x74   :  { %4439 = vmatprep.subr.mxu0 %v7205_v55  ;;  %7206 = vst [vmem:[#allocation13_spill] sm:$0xff] %v5777_v27  ;;  %4469 = vmatprep.subr.mxu1 %v7207_v17  ;;  %7211 = vst [vmem:[#allocation15_spill] sm:$0xff] %v5788_v14  ;;  %v94_v55 = vld [vmem:[%s6945_s5 + $0x1b8] sm:$0xff]  ;;  %v5841_v17 = vsub.f32 %v97_v13, %v5777_v27 }
  0x75   :  { %4440 = vmatpush3.msra.mxu0 %v7209_v6  ;;  %7210 = vst [vmem:[#allocation14_spill] sm:$0xff] %v5786_v32  ;;  %4470 = vmatpush3.msra.mxu1 %v7213_v49  ;;  %7217 = vst [vmem:[#allocation20_spill] sm:$0xff] %v5835_v41  ;;  %v5850_v6 = vand.u32 4294901760, %v78_v53  ;;  %v7032_v49 = vand.u32 4294901760, %v5784_v22  ;;  %v5874_v39 = vand.u32 4294901760, %v94_v55  ;;  %v5896_v13 = vsub.f32 %v95_v24, %v5835_v41 }
  0x76   :  { %898 = vmatmul.mubr.f32.vlgmr.msra.gmra.mxu0 %v7214_v31  ;;  %4471 = vmatprep.subr.mxu1 %v7215_v62  ;;  %v7221_v62 = vld [vmem:[#allocation32_spill] sm:$0xff]  ;;  %v7036_v30 = vand.u32 4294901760, %v5841_v17  ;;  %7229 = vst [vmem:[#allocation18_spill] sm:$0xff] %v5934_v40 }
  0x77   :  { %4485 = vmatprep.subr.mxu0 %v5652_v34  ;;  %4472 = vmatpush3.msra.mxu1 %v7157_v44  ;;  %v5846_v44 = vsub.f32 %v80_v36, %v5788_v14  ;;  %7220 = vst [vmem:[#allocation24_spill] sm:$0xff] %v5850_v6  ;;  %7223 = vst [vmem:[#allocation26_spill] sm:$0xff] %v5874_v39  ;;  %v5890_v36 = vld [vmem:[%s6945_s5 + $0x1a8] sm:$0xff]  ;;  %v5904_v0 = vsub.f32 %v78_v53, %v5850_v6 }
  0x78   :  { %4486 = vmatpush3.msra.mxu0 %v5638_v48  ;;  %4473 = vmatprep.subr.mxu1 %v7159_v63  ;;  %v5859_v63 = vsub.f32 %v96_v9, %v5786_v32  ;;  %v77_v9 = vld [vmem:[%s6945_s5 + $0x130] sm:$0xff]  ;;  %7224 = vst [vmem:[#allocation27_spill] sm:$0xff] %v5896_v13  ;;  %v5909_v56 = vsub.f32 %v5784_v22, %v7032_v49  ;;  %v75_v49 = vld [vmem:[%s6945_s5 + $0x120] sm:$0xff] }
  0x79   :  { %7218 = vst [vmem:[#allocation21_spill] sm:$0xff] %v5846_v44  ;;  %4487 = vmatprep.subr.mxu0 %v5669_v28  ;;  %903 = vmatprep.mubr.f32.mxu0 %v7221_v62  ;;  %7226 = vst [vmem:[#allocation17_spill] sm:$0xff] %v5904_v0  ;;  %v5941_v53 = vsub.f32 %v5841_v17, %v7036_v30  ;;  %v74_v30 = vld [vmem:[%s6945_s5 + $0x118] sm:$0xff] }
  0x7a   :  { %7222 = vst [vmem:[#allocation7_spill] sm:$0xff] %v5859_v63  ;;  %4474 = vmatpush3.msra.mxu1 %v7160_v51  ;;  %4488 = vmatpush3.msra.mxu0 %v5671_v46  ;;  %v93_v51 = vld [vmem:[%s6945_s5 + $0x1b0] sm:$0xff] }
  0x7b   :  { %905 = vmatmul.mubr.f32.gmra.mxu0 %v5507_v7  ;;  %4475 = vmatprep.subr.mxu1 %v7162_v18  ;;  %v5901_v18 = vsub.f32 %v79_v25, %v5848_v21  ;;  %v5919_v24 = vand.u32 4294901760, %v93_v51  ;;  %v5921_v25 = vand.u32 4294901760, %v77_v9 }
  0x7c   :  { %4489 = vmatprep.subr.mxu0 %v5676_v50  ;;  %4476 = vmatpush3.msra.mxu1 %v5344_v38  ;;  %v5917_v38 = vsub.f32 %v5810_v12, %v7033_v11  ;;  %v5932_v11 = vand.u32 4294901760, %v5890_v36  ;;  %v5968_v50 = vand.u32 4294901760, %v75_v49 }
  0x7d   :  { %7225 = vst [vmem:[#allocation30_spill] sm:$0xff] %v5901_v18  ;;  %4490 = vmatpush3.msra.mxu0 %v5681_v47  ;;  %4477 = vmatprep.subr.mxu1 %v5361_v52  ;;  %7227 = vst [vmem:[#allocation31_spill] sm:$0xff] %v5921_v25 }
  0x7e   :  { %4491 = vmatprep.subr.mxu0 %v5711_v37  ;;  %4478 = vmatpush3.msra.mxu1 %v5383_v58  ;;  %7228 = vst [vmem:[#allocation28_spill] sm:$0xff] %v5932_v11  ;;  %v7230_v58 = vand.u32 4294901760, %v5818_v1  ;;  %7233 = vst [vmem:[#allocation19_spill] sm:$0xff] %v5968_v50  ;;  %v7234_v37 = vand.u32 4294901760, %v5775_v43  ;;  %v73_v43 = vld [vmem:[%s6945_s5 + $0x110] sm:$0xff] }
  0x7f   :  { %1007 = vmatprep.mubr.f32.mxu1 %v7212_v19  ;;  %4492 = vmatpush3.msra.mxu0 %v5713_v57  ;;  %v5955_v19 = vsub.f32 %v94_v55, %v5874_v39  ;;  %v7232_v57 = vand.u32 4294901760, %v5846_v44  ;;  %v6001_v55 = vsub.f32 %v93_v51, %v5919_v24  ;;  %v7239_v51 = vand.u32 4294901760, %v5896_v13 }
  0x80   :  { %v5946_v52 = vsub.f32 %v5818_v1, %v7230_v58  ;;  %1009 = vmatmul.mubr.f32.vlgmr.msra.gmra.mxu1 %v7214_v31  ;;  %4493 = vmatprep.subr.mxu0 %v5742_v5  ;;  %v1293_v31 = vand.u32 4294901760, %v5917_v38  ;;  %v5976_v5 = vsub.f32 %v77_v9, %v5921_v25  ;;  %v7235_v58 = vand.u32 4294901760, %v5859_v63 }
  0x81   :  { %7231 = vst [vmem:[#allocation29_spill] sm:$0xff] %v5955_v19  ;;  %v5966_v47 = vsub.f32 %v5846_v44, %v7232_v57  ;;  %4523 = vmatprep.subr.mxu1 %v7234_v37  ;;  %4494 = vmatpush3.msra.mxu0 %v5734_v4  ;;  %v5986_v57 = vld [vmem:[%s6945_s5 + $0x198] sm:$0xff]  ;;  %v7236_v37 = vand.u32 4294901760, %v5747_v2  ;;  %v5993_v9 = vsub.f32 %v76_v16, %v5934_v40  ;;  %v5996_v38 = vand.u32 4294901760, %v5951_v20  ;;  %v89_v44 = vld [vmem:[%s6945_s5 + $0x190] sm:$0xff] }
  0x82   :  { %v5981_v46 = vsub.f32 %v5859_v63, %v7235_v58  ;;  %4495 = vmatprep.subr.mxu0 %v5777_v27  ;;  %v5998_v58 = vand.u32 4294901760, %v74_v30  ;;  %7237 = vst [vmem:[#allocation32_spill] sm:$0xff] %v6001_v55  ;;  %v34_v2 = vld [vmem:[%s6940_s0 + $0x18] sm:$0xff]  ;;  %1014 = vmatprep.mubr.f32.mxu1 %v7221_v62  ;;  %v1300_v16 = vand.u32 4294901760, %v5941_v53  ;;  %v6017_v4 = vsub.f32 %v5896_v13, %v7239_v51  ;;  %v33_v63 = vld [vmem:[%s6940_s0 + $0x10] sm:$0xff]  ;;  %v6054_v62 = vld [vmem:[%s6945_s5 + $0x188] sm:$0xff] }
  0x83   :  { %4524 = vmatpush3.msra.mxu1 %v7236_v37  ;;  %v7238_v37 = vand.u32 4294901760, %v5799_v33  ;;  %4496 = vmatpush3.msra.mxu0 %v5763_v42  ;;  %v7240_v33 = vand.u32 4294901760, %v5804_v54  ;;  %v6028_v53 = vsub.f32 %v75_v49, %v5968_v50  ;;  %v6036_v27 = vand.u32 4294901760, %v5986_v57  ;;  %v38_v13 = vld [vmem:[%s6940_s0 + $0x38] sm:$0xff] }
  0x84   :  { %1016 = vmatmul.mubr.f32.gmra.mxu1 %v5507_v7  ;;  %4497 = vmatprep.subr.mxu0 %v5786_v32  ;;  %v1307_v54 = vand.u32 4294901760, %v5981_v46  ;;  %v7244_v49 = vand.u32 4294901760, %v5904_v0  ;;  %v72_v7 = vld [vmem:[%s6945_s5 + $0x108] sm:$0xff]  ;;  %v6059_v42 = vand.u32 4294901760, %v34_v2  ;;  %v7246_v46 = vand.u32 4294901760, %v5823_v59 }
  0x85   :  { %4525 = vmatprep.subr.mxu1 %v7238_v37  ;;  %7241 = vst [vmem:[#allocation33_spill] sm:$0xff] %v6028_v53  ;;  %v7242_v37 = vand.u32 4294901760, %v5901_v18  ;;  %7243 = vst [vmem:[#allocation34_spill] sm:$0xff] %v6036_v27  ;;  %4498 = vmatpush3.msra.mxu0 %v5788_v14  ;;  %v7248_v59 = vand.u32 4294901760, %v5833_v3  ;;  %v7251_v1 = vand.u32 4294901760, %v5867_v8  ;;  %v37_v14 = vld [vmem:[%s6940_s0 + $0x30] sm:$0xff] }
  0x86   :  { %4526 = vmatpush3.msra.mxu1 %v7240_v33  ;;  %v6047_v33 = vsub.f32 %v5904_v0, %v7244_v49  ;;  %7245 = vst [vmem:[#allocation35_spill] sm:$0xff] %v6059_v42  ;;  %v6065_v49 = vsub.f32 %v74_v30, %v5998_v58  ;;  %v6070_v0 = vsub.f32 %v5890_v36, %v5932_v11  ;;  %v1314_v30 = vand.u32 4294901760, %v6017_v4 }
  0x87   :  { %v6033_v51 = vsub.f32 %v5901_v18, %v7242_v37  ;;  %v6049_v37 = vand.u32 4294901760, %v73_v43  ;;  %4527 = vmatprep.subr.mxu1 %v7246_v46  ;;  %v6072_v18 = vand.u32 4294901760, %v33_v63  ;;  %4499 = vmatprep.subr.mxu0 %v5835_v41  ;;  %v7249_v46 = vand.u32 4294901760, %v5955_v19 }
  0x88   :  { %4528 = vmatpush3.msra.mxu1 %v7248_v59  ;;  %v6086_v36 = vand.u32 4294901760, %v89_v44  ;;  %4500 = vmatpush3.msra.mxu0 %v5848_v21  ;;  %v6094_v59 = vand.u32 4294901760, %v6054_v62  ;;  %v6096_v4 = vand.u32 4294901760, %v72_v7  ;;  %v7252_v8 = vand.u32 4294901760, %v5872_v61  ;;  %v71_v21 = vld [vmem:[%s6945_s5 + $0x100] sm:$0xff] }
  0x89   :  { %7247 = vst [vmem:[#allocation36_spill] sm:$0xff] %v6072_v18  ;;  %v6084_v32 = vsub.f32 %v5955_v19, %v7249_v46  ;;  %4529 = vmatprep.subr.mxu1 %v7251_v1  ;;  %v1202_v3 = vand.u32 4294901760, %v6033_v51  ;;  %v6100_v46 = vsub.f32 %v5951_v20, %v5996_v38  ;;  %4501 = vmatprep.subr.mxu0 %v5874_v39  ;;  %v1209_v1 = vand.u32 4294901760, %v6047_v33 }
  0x8a   :  { %7250 = vst [vmem:[#allocation37_spill] sm:$0xff] %v6086_v36  ;;  %4530 = vmatpush3.msra.mxu1 %v7252_v8  ;;  %v6110_v51 = vsub.f32 %v73_v43, %v6049_v37  ;;  %v6116_v20 = vsub.f32 %v34_v2, %v6059_v42  ;;  %v6118_v41 = vand.u32 4294901760, %v38_v13  ;;  %4502 = vmatpush3.msra.mxu0 %v5850_v6  ;;  %v7254_v61 = vand.u32 4294901760, %v6001_v55  ;;  %v87_v43 = vld [vmem:[%s6945_s5 + $0x180] sm:$0xff] }
  0x8b   :  { %4531 = vmatprep.subr.mxu1 %v1293_v31  ;;  %v6129_v39 = vsub.f32 %v33_v63, %v6072_v18  ;;  %v6133_v2 = vsub.f32 %v5986_v57, %v6036_v27  ;;  %v7255_v31 = vand.u32 4294901760, %v5909_v56  ;;  %4503 = vmatprep.subr.mxu0 %v5919_v24  ;;  %v7256_v33 = vand.u32 4294901760, %v5976_v5 }
  0x8c   :  { %7253 = vst [vmem:[#allocation38_spill] sm:$0xff] %v6118_v41  ;;  %v1327_v8 = vsub.f32 %v6001_v55, %v7254_v61  ;;  %v1321_v61 = vand.u32 4294901760, %v6084_v32  ;;  %v6143_v19 = vand.u32 4294901760, %v37_v14  ;;  %4504 = vmatpush3.msra.mxu0 %v5921_v25  ;;  %v6147_v63 = vsub.f32 %v72_v7, %v6096_v4  ;;  %1373 = vmatprep.mubr.f32.mxu1 %v6059_v42  ;;  %v7301_v42 = vld [vmem:[#allocation31_spill] sm:$0xff] }
  0x8d   :  { %4532 = vmatpush3.msra.mxu1 %v7255_v31  ;;  %v1215_v6 = vsub.f32 %v5976_v5, %v7256_v33  ;;  %v6150_v57 = vand.u32 4294901760, %v71_v21  ;;  %v6153_v32 = vsub.f32 %v89_v44, %v6086_v36  ;;  %v7259_v31 = vand.u32 4294901760, %v5946_v52  ;;  %4505 = vmatprep.subr.mxu0 %v5932_v11 }
  0x8e   :  { %7257 = vst [vmem:[#allocation39_spill] sm:$0xff] %v6143_v19  ;;  %4533 = vmatprep.subr.mxu1 %v1300_v16  ;;  %v6158_v33 = vand.u32 4294901760, %v87_v43  ;;  %v7085_v16 = vand.u32 4294901760, %v6116_v20  ;;  %v6163_v7 = vsub.f32 %v38_v13, %v6118_v41  ;;  %4506 = vmatpush3.msra.mxu0 %v5934_v40  ;;  %v1328_v56 = vand.u32 4294901760, %v1327_v8 }
  0x8f   :  { %7258 = vst [vmem:[#allocation40_spill] sm:$0xff] %v6150_v57  ;;  %4534 = vmatpush3.msra.mxu1 %v7259_v31  ;;  %v7260_v44 = vand.u32 4294901760, %v6070_v0  ;;  %v7261_v25 = vand.u32 4294901760, %v5966_v47  ;;  %4507 = vmatprep.subr.mxu0 %v5996_v38  ;;  %v7262_v13 = vand.u32 4294901760, %v5993_v9  ;;  %v6179_v8 = vsub.f32 %v37_v14, %v6143_v19 }
  0x90   :  { %4535 = vmatprep.subr.mxu1 %v1307_v54  ;;  %4508 = vmatpush3.msra.mxu0 %v5968_v50  ;;  %v1216_v47 = vand.u32 4294901760, %v1215_v6  ;;  %v6190_v31 = vsub.f32 %v71_v21, %v6150_v57  ;;  %v1120_v14 = vsub.f32 %v6116_v20, %v7085_v16  ;;  %v7268_v55 = vand.u32 4294901760, %v6133_v2 }
  0x91   :  { %v1334_v52 = vsub.f32 %v6070_v0, %v7260_v44  ;;  %4536 = vmatpush3.msra.mxu1 %v7261_v25  ;;  %v1222_v54 = vsub.f32 %v5993_v9, %v7262_v13  ;;  %v6183_v44 = vsub.f32 %v6054_v62, %v6094_v59  ;;  %v7263_v25 = vand.u32 4294901760, %v6100_v46  ;;  %4509 = vmatprep.subr.mxu0 %v6036_v27 }
  0x92   :  { %4537 = vmatprep.subr.mxu1 %v1314_v30  ;;  %7264 = vst [vmem:[#allocation41_spill] sm:$0xff] %v6190_v31  ;;  %v7265_v62 = vand.u32 4294901760, %v6028_v53  ;;  %4510 = vmatpush3.msra.mxu0 %v5998_v58  ;;  %v1348_v16 = vsub.f32 %v6133_v2, %v7268_v55  ;;  %v7270_v55 = vand.u32 4294901760, %v6153_v32 }
  0x93   :  { %v1341_v11 = vsub.f32 %v6100_v46, %v7263_v25  ;;  %4538 = vmatpush3.msra.mxu1 %v1202_v3  ;;  %v6202_v25 = vsub.f32 %v87_v43, %v6158_v33  ;;  %v1335_v21 = vand.u32 4294901760, %v1334_v52  ;;  %v7267_v3 = vand.u32 4294901760, %v6129_v39  ;;  %4511 = vmatprep.subr.mxu0 %v6086_v36 }
  0x94   :  { %v1229_v6 = vsub.f32 %v6028_v53, %v7265_v62  ;;  %4539 = vmatprep.subr.mxu1 %v1321_v61  ;;  %v1223_v62 = vand.u32 4294901760, %v1222_v54  ;;  %v7269_v43 = vand.u32 4294901760, %v6065_v49  ;;  %4512 = vmatpush3.msra.mxu0 %v6049_v37  ;;  %v1355_v27 = vsub.f32 %v6153_v32, %v7270_v55 }
  0x95   :  { %7266 = vst [vmem:[#allocation42_spill] sm:$0xff] %v6202_v25  ;;  %v1126_v13 = vsub.f32 %v6129_v39, %v7267_v3  ;;  %4540 = vmatpush3.msra.mxu1 %v1209_v1  ;;  %v1342_v3 = vand.u32 4294901760, %v1341_v11  ;;  %4513 = vmatprep.subr.mxu0 %v6094_v59  ;;  %v1121_v54 = vand.u32 4294901760, %v1120_v14  ;;  %v1349_v30 = vand.u32 4294901760, %v1348_v16 }
  0x96   :  { %v1236_v61 = vsub.f32 %v6065_v49, %v7269_v43  ;;  %4541 = vmatprep.subr.mxu1 %v1328_v56  ;;  %v1230_v36 = vand.u32 4294901760, %v1229_v6  ;;  %v7271_v43 = vand.u32 4294901760, %v6163_v7  ;;  %4514 = vmatpush3.msra.mxu0 %v6096_v4  ;;  %v7272_v55 = vand.u32 4294901760, %v6110_v51 }
  0x97   :  { %4542 = vmatpush3.msra.mxu1 %v1216_v47  ;;  %v1127_v11 = vand.u32 4294901760, %v1126_v13  ;;  %4515 = vmatprep.subr.mxu0 %v6158_v33  ;;  %v7273_v6 = vand.u32 4294901760, %v6179_v8  ;;  %v1356_v16 = vand.u32 4294901760, %v1355_v27  ;;  %v7275_v13 = vand.u32 4294901760, %v6147_v63 }
  0x98   :  { %v1135_v52 = vsub.f32 %v6163_v7, %v7271_v43  ;;  %4543 = vmatprep.subr.mxu1 %v1335_v21  ;;  %v1243_v1 = vsub.f32 %v6110_v51, %v7272_v55  ;;  %v1237_v14 = vand.u32 4294901760, %v1236_v61  ;;  %v7274_v21 = vand.u32 4294901760, %v6183_v44  ;;  %4516 = vmatpush3.msra.mxu0 %v6150_v57 }
  0x99   :  { %4544 = vmatpush3.msra.mxu1 %v1223_v62  ;;  %v1141_v43 = vsub.f32 %v6179_v8, %v7273_v6  ;;  %v1250_v55 = vsub.f32 %v6147_v63, %v7275_v13  ;;  %1122 = vmatprep.mubr.f32.mxu0 %v1121_v54  ;;  %v7276_v61 = vand.u32 4294901760, %v6202_v25  ;;  %v7280_v54 = vld [vmem:[#allocation7_spill] sm:$0xff]  ;;  %v7287_v13 = vld [vmem:[#allocation9_spill] sm:$0xff] }
  0x9a   :  { %v1362_v56 = vsub.f32 %v6183_v44, %v7274_v21  ;;  %4545 = vmatprep.subr.mxu1 %v1342_v3  ;;  %v1136_v62 = vand.u32 4294901760, %v1135_v52  ;;  %1128 = vmatmul.mubr.f32.vlgmr.msra.gmra.mxu0 %v1127_v11  ;;  %v1244_v6 = vand.u32 4294901760, %v1243_v1  ;;  %v7277_v21 = vand.u32 4294901760, %v6190_v31  ;;  %v7279_v1 = vld [vmem:[#allocation23_spill] sm:$0xff]  ;;  %v7282_v11 = vld [vmem:[#allocation21_spill] sm:$0xff] }
  0x9b   :  { %4546 = vmatpush3.msra.mxu1 %v1230_v36  ;;  %v1369_v47 = vsub.f32 %v6202_v25, %v7276_v61  ;;  %4561 = vmatprep.subr.mxu0 %v5690_v23  ;;  %v1142_v27 = vand.u32 4294901760, %v1141_v43  ;;  %v1251_v36 = vand.u32 4294901760, %v1250_v55  ;;  %v7285_v43 = vld [vmem:[#allocation8_spill] sm:$0xff]  ;;  %v7288_v55 = vld [vmem:[#allocation29_spill] sm:$0xff] }
  0x9c   :  { %4547 = vmatprep.subr.mxu1 %v1349_v30  ;;  %v1257_v3 = vsub.f32 %v6190_v31, %v7277_v21  ;;  %v1363_v57 = vand.u32 4294901760, %v1362_v56  ;;  %4562 = vmatpush3.msra.mxu0 %v5667_v60  ;;  %v7281_v56 = vld [vmem:[#allocation6_spill] sm:$0xff]  ;;  %v7290_v61 = vld [vmem:[#allocation17_spill] sm:$0xff]  ;;  %v7292_v21 = vld [vmem:[#allocation32_spill] sm:$0xff] }
  0x9d   :  { %4548 = vmatpush3.msra.mxu1 %v1237_v14  ;;  %4563 = vmatprep.subr.mxu0 %v5706_v35  ;;  %v1370_v52 = vand.u32 4294901760, %v1369_v47  ;;  %v7283_v47 = vld [vmem:[#allocation25_spill] sm:$0xff]  ;;  %v7284_v14 = vld [vmem:[#allocation27_spill] sm:$0xff] }
  0x9e   :  { %4549 = vmatprep.subr.mxu1 %v1356_v16  ;;  %1137 = vmatprep.mubr.f32.mxu0 %v1136_v62  ;;  %v1258_v30 = vand.u32 4294901760, %v1257_v3  ;;  %v7286_v16 = vld [vmem:[#allocation30_spill] sm:$0xff]  ;;  %v7289_v62 = vld [vmem:[#allocation11_spill] sm:$0xff]  ;;  %v7293_v3 = vld [vmem:[#allocation13_spill] sm:$0xff] }
  0x9f   :  { %4550 = vmatpush3.msra.mxu1 %v1244_v6  ;;  %4564 = vmatpush3.msra.mxu0 %v5699_v29  ;;  %v7291_v6 = vld [vmem:[#allocation10_spill] sm:$0xff] }
  0xa0   :  { %1143 = vmatmul.mubr.f32.gmra.mxu0 %v1142_v27  ;;  %4551 = vmatprep.subr.mxu1 %v1363_v57  ;;  %v7278_v57 = vld [vmem:[#allocation16_spill] sm:$0xff] }
  0xa1   :  { %4565 = vmatprep.subr.mxu0 %v5719_v45  ;;  %4552 = vmatpush3.msra.mxu1 %v1251_v36  ;;  %v7294_v27 = vld [vmem:[#allocation12_spill] sm:$0xff]  ;;  %v7295_v36 = vld [vmem:[#allocation14_spill] sm:$0xff] }
  0xa2   :  { %4566 = vmatpush3.msra.mxu0 %v5725_v26  ;;  %4553 = vmatprep.subr.mxu1 %v1370_v52  ;;  %v7296_v52 = vld [vmem:[#allocation15_spill] sm:$0xff] }
  0xa3   :  { %4567 = vmatprep.subr.mxu0 %v5767_v15  ;;  %4554 = vmatpush3.msra.mxu1 %v1258_v30  ;;  %v7297_v30 = vld [vmem:[#allocation20_spill] sm:$0xff] }
  0xa4   :  { %4568 = vmatpush3.msra.mxu0 %v5761_v10  ;;  %1375 = vmatmul.mubr.f32.vlgmr.msra.gmra.mxu1 %v6072_v18  ;;  %v7300_v18 = vld [vmem:[#allocation24_spill] sm:$0xff] }
  0xa5   :  { %4569 = vmatprep.subr.mxu0 %v5810_v12  ;;  %4599 = vmatprep.subr.mxu1 %v5652_v34 }
  0xa6   :  { %4570 = vmatpush3.msra.mxu0 %v5784_v22  ;;  %4600 = vmatpush3.msra.mxu1 %v5638_v48 }
  0xa7   :  { %4571 = vmatprep.subr.mxu0 %v5841_v17  ;;  %4601 = vmatprep.subr.mxu1 %v5669_v28 }
  0xa8   :  { %1380 = vmatprep.mubr.f32.mxu1 %v6118_v41  ;;  %4572 = vmatpush3.msra.mxu0 %v7278_v57  ;;  %v7299_v41 = vld [vmem:[#allocation26_spill] sm:$0xff] }
  0xa9   :  { %4602 = vmatpush3.msra.mxu1 %v7279_v1  ;;  %4573 = vmatprep.subr.mxu0 %v7280_v54 }
  0xaa   :  { %1382 = vmatmul.mubr.f32.gmra.mxu1 %v6143_v19  ;;  %4603 = vmatprep.subr.mxu1 %v7281_v56  ;;  %v7298_v19 = vld [vmem:[#allocation22_spill] sm:$0xff] }
  0xab   :  { %4574 = vmatpush3.msra.mxu0 %v7282_v11  ;;  %4604 = vmatpush3.msra.mxu1 %v7283_v47 }
  0xac   :  { %4575 = vmatprep.subr.mxu0 %v7284_v14  ;;  %4605 = vmatprep.subr.mxu1 %v7285_v43 }
  0xad   :  { %4576 = vmatpush3.msra.mxu0 %v7286_v16  ;;  %4606 = vmatpush3.msra.mxu1 %v7287_v13 }
  0xae   :  { %4577 = vmatprep.subr.mxu0 %v7288_v55  ;;  %4607 = vmatprep.subr.mxu1 %v7289_v62 }
  0xaf   :  { %4578 = vmatpush3.msra.mxu0 %v7290_v61  ;;  %4608 = vmatpush3.msra.mxu1 %v7291_v6 }
  0xb0   :  { %4579 = vmatprep.subr.mxu0 %v7292_v21  ;;  %4609 = vmatprep.subr.mxu1 %v7293_v3 }
  0xb1   :  { %4580 = vmatpush3.msra.mxu0 %v5976_v5  ;;  %4610 = vmatpush3.msra.mxu1 %v7294_v27 }
  0xb2   :  { %4581 = vmatprep.subr.mxu0 %v6070_v0  ;;  %4611 = vmatprep.subr.mxu1 %v7295_v36 }
  0xb3   :  { %4582 = vmatpush3.msra.mxu0 %v5993_v9  ;;  %4612 = vmatpush3.msra.mxu1 %v7296_v52 }
  0xb4   :  { %4583 = vmatprep.subr.mxu0 %v6100_v46  ;;  %4613 = vmatprep.subr.mxu1 %v7297_v30 }
  0xb5   :  { %4584 = vmatpush3.msra.mxu0 %v6028_v53  ;;  %4614 = vmatpush3.msra.mxu1 %v7298_v19  ;;  %v7302_v53 = vld [vmem:[#allocation28_spill] sm:$0xff] }
  0xb6   :  { %4585 = vmatprep.subr.mxu0 %v6133_v2  ;;  %4615 = vmatprep.subr.mxu1 %v7299_v41 }
  0xb7   :  { %4586 = vmatpush3.msra.mxu0 %v6065_v49  ;;  %4616 = vmatpush3.msra.mxu1 %v7300_v18 }
  0xb8   :  { %4587 = vmatprep.subr.mxu0 %v6153_v32  ;;  %4617 = vmatprep.subr.mxu1 %v5919_v24 }
  0xb9   :  { %4588 = vmatpush3.msra.mxu0 %v6110_v51  ;;  %4618 = vmatpush3.msra.mxu1 %v7301_v42  ;;  %v7303_v42 = vld [vmem:[#allocation34_spill] sm:$0xff] }
  0xba   :  { %4589 = vmatprep.subr.mxu0 %v6183_v44  ;;  %4619 = vmatprep.subr.mxu1 %v7302_v53  ;;  %v7304_v53 = vand.u32 4294901760, %v5690_v23  ;;  %v7309_v23 = vand.u32 4294901760, %v5719_v45  ;;  %v7315_v45 = vand.u32 4294901760, %v6129_v39 }
  0xbb   :  { %4590 = vmatpush3.msra.mxu0 %v6147_v63  ;;  %4620 = vmatpush3.msra.mxu1 %v5934_v40  ;;  %v7305_v40 = vand.u32 4294901760, %v5667_v60  ;;  %v7310_v60 = vand.u32 4294901760, %v5725_v26  ;;  %v7317_v26 = vand.u32 4294901760, %v5784_v22  ;;  %v7322_v22 = vand.u32 4294901760, %v7280_v54  ;;  %v7333_v54 = vld [vmem:[#allocation33_spill] sm:$0xff] }
  0xbc   :  { %4591 = vmatprep.subr.mxu0 %v6202_v25  ;;  %4621 = vmatprep.subr.mxu1 %v5996_v38  ;;  %v7306_v25 = vld [vmem:[#allocation37_spill] sm:$0xff] }
  0xbd   :  { %4592 = vmatpush3.msra.mxu0 %v6190_v31  ;;  %1517 = vmatprep.mubr.f32.mxu0 %v6116_v20  ;;  %v7307_v31 = vand.u32 4294901760, %v5706_v35  ;;  %v7311_v35 = vand.u32 4294901760, %v5767_v15  ;;  %v7318_v15 = vand.u32 4294901760, %v5841_v17  ;;  %v7326_v17 = vand.u32 4294901760, %v7288_v55 }
  0xbe   :  { %4622 = vmatpush3.msra.mxu1 %v5968_v50  ;;  %1520 = vmatmul.mubr.f32.vlgmr.msra.gmra.mxu0 %v6129_v39  ;;  %v7308_v50 = vand.u32 4294901760, %v5699_v29  ;;  %v7314_v29 = vand.u32 4294901760, %v5761_v10  ;;  %v7319_v10 = vand.u32 4294901760, %v6163_v7  ;;  %v7320_v39 = vand.u32 4294901760, %v7278_v57 }
  0xbf   :  { %4623 = vmatprep.subr.mxu1 %v7303_v42  ;;  %4637 = vmatprep.subr.mxu0 %v7304_v53  ;;  %v7316_v53 = vand.u32 4294901760, %v5810_v12  ;;  %v7325_v12 = vand.u32 4294901760, %v7286_v16  ;;  %v7331_v57 = vand.u32 4294901760, %v5993_v9  ;;  %v7336_v9 = vand.u32 4294901760, %v6065_v49  ;;  %v7343_v49 = vld [vmem:[#allocation18_spill] sm:$0xff] }
  0xc0   :  { %4624 = vmatpush3.msra.mxu1 %v5998_v58  ;;  %4638 = vmatpush3.msra.mxu0 %v7305_v40  ;;  %v7312_v40 = vld [vmem:[#allocation40_spill] sm:$0xff] }
  0xc1   :  { %4625 = vmatprep.subr.mxu1 %v7306_v25  ;;  %4639 = vmatprep.subr.mxu0 %v7307_v31  ;;  %v7329_v31 = vand.u32 4294901760, %v5976_v5  ;;  %v7334_v5 = vand.u32 4294901760, %v7333_v54 }
  0xc2   :  { %1526 = vmatprep.mubr.f32.mxu0 %v6163_v7  ;;  %4626 = vmatpush3.msra.mxu1 %v6049_v37  ;;  %v7328_v7 = vand.u32 4294901760, %v7292_v21 }
  0xc3   :  { %4640 = vmatpush3.msra.mxu0 %v7308_v50  ;;  %4627 = vmatprep.subr.mxu1 %v6094_v59  ;;  %v7313_v50 = vand.u32 4294901760, %v6116_v20  ;;  %v7327_v20 = vand.u32 4294901760, %v7290_v61 }
  0xc4   :  { %1529 = vmatmul.mubr.f32.gmra.mxu0 %v6179_v8  ;;  %4641 = vmatprep.subr.mxu0 %v7309_v23 }
  0xc5   :  { %4628 = vmatpush3.msra.mxu1 %v6096_v4  ;;  %4642 = vmatpush3.msra.mxu0 %v7310_v60 }
  0xc6   :  { %4629 = vmatprep.subr.mxu1 %v6158_v33  ;;  %4643 = vmatprep.subr.mxu0 %v7311_v35 }
  0xc7   :  { %4630 = vmatpush3.msra.mxu1 %v7312_v40  ;;  %1633 = vmatprep.mubr.f32.mxu1 %v7313_v50 }
  0xc8   :  { %4644 = vmatpush3.msra.mxu0 %v7314_v29  ;;  %1637 = vmatmul.mubr.f32.vlgmr.msra.gmra.mxu1 %v7315_v45 }
  0xc9   :  { %4645 = vmatprep.subr.mxu0 %v7316_v53  ;;  %4675 = vmatprep.subr.mxu1 %v5652_v34  ;;  %v7321_v34 = vand.u32 4294901760, %v6179_v8  ;;  %v7330_v8 = vand.u32 4294901760, %v6070_v0  ;;  %v7335_v0 = vand.u32 4294901760, %v6133_v2  ;;  %v7341_v2 = vld [vmem:[#allocation28_spill] sm:$0xff] }
  0xca   :  { %4646 = vmatpush3.msra.mxu0 %v7317_v26  ;;  %4676 = vmatpush3.msra.mxu1 %v5638_v48  ;;  %v7323_v48 = vand.u32 4294901760, %v7282_v11  ;;  %v7339_v11 = vld [vmem:[#allocation31_spill] sm:$0xff] }
  0xcb   :  { %4647 = vmatprep.subr.mxu0 %v7318_v15  ;;  %4677 = vmatprep.subr.mxu1 %v5669_v28  ;;  %v7324_v28 = vand.u32 4294901760, %v7284_v14  ;;  %v7349_v14 = vld [vmem:[#allocation19_spill] sm:$0xff] }
  0xcc   :  { %1644 = vmatprep.mubr.f32.mxu1 %v7319_v10  ;;  %4648 = vmatpush3.msra.mxu0 %v7320_v39 }
  0xcd   :  { %4678 = vmatpush3.msra.mxu1 %v7279_v1  ;;  %4649 = vmatprep.subr.mxu0 %v7322_v22  ;;  %v7332_v1 = vand.u32 4294901760, %v6100_v46  ;;  %v7337_v46 = vand.u32 4294901760, %v6153_v32 }
  0xce   :  { %1648 = vmatmul.mubr.f32.gmra.mxu1 %v7321_v34  ;;  %4679 = vmatprep.subr.mxu1 %v7281_v56  ;;  %v7338_v56 = vand.u32 4294901760, %v6110_v51 }
  0xcf   :  { %4650 = vmatpush3.msra.mxu0 %v7323_v48  ;;  %4680 = vmatpush3.msra.mxu1 %v7283_v47  ;;  %v7348_v47 = vld [vmem:[#allocation35_spill] sm:$0xff] }
  0xd0   :  { %4651 = vmatprep.subr.mxu0 %v7324_v28  ;;  %4681 = vmatprep.subr.mxu1 %v7285_v43 }
  0xd1   :  { %4652 = vmatpush3.msra.mxu0 %v7325_v12  ;;  %4682 = vmatpush3.msra.mxu1 %v7287_v13  ;;  %v1941_v13 = vld [vmem:[%s6941_s1] sm:$0xff] }
  0xd2   :  { %4653 = vmatprep.subr.mxu0 %v7326_v17  ;;  %4683 = vmatprep.subr.mxu1 %v7289_v62 }
  0xd3   :  { %4654 = vmatpush3.msra.mxu0 %v7327_v20  ;;  %4684 = vmatpush3.msra.mxu1 %v7291_v6  ;;  %v6473_v6 = vand.u32 4294901760, %v1941_v13 }
  0xd4   :  { %4655 = vmatprep.subr.mxu0 %v7328_v7  ;;  %4685 = vmatprep.subr.mxu1 %v7293_v3 }
  0xd5   :  { %4656 = vmatpush3.msra.mxu0 %v7329_v31  ;;  %4686 = vmatpush3.msra.mxu1 %v7294_v27 }
  0xd6   :  { %4657 = vmatprep.subr.mxu0 %v7330_v8  ;;  %4687 = vmatprep.subr.mxu1 %v7295_v36  ;;  %v6483_v36 = vsub.f32 %v1941_v13, %v6473_v6 }
  0xd7   :  { %4658 = vmatpush3.msra.mxu0 %v7331_v57  ;;  %4688 = vmatpush3.msra.mxu1 %v7296_v52 }
  0xd8   :  { %4659 = vmatprep.subr.mxu0 %v7332_v1  ;;  %4689 = vmatprep.subr.mxu1 %v7297_v30  ;;  %v6490_v23 = vand.u32 4294901760, %v6483_v36 }
  0xd9   :  { %4660 = vmatpush3.msra.mxu0 %v7334_v5  ;;  %4690 = vmatpush3.msra.mxu1 %v7298_v19  ;;  %v7340_v19 = vand.u32 4294901760, %v6183_v44  ;;  %v7350_v44 = vld [vmem:[#allocation36_spill] sm:$0xff] }
  0xda   :  { %4661 = vmatprep.subr.mxu0 %v7335_v0  ;;  %4691 = vmatprep.subr.mxu1 %v7299_v41  ;;  %v7342_v41 = vand.u32 4294901760, %v6147_v63  ;;  %v7351_v63 = vld [vmem:[#allocation38_spill] sm:$0xff]  ;;  %v2097_v35 = vsub.f32 %v6483_v36, %v6490_v23 }
  0xdb   :  { %4662 = vmatpush3.msra.mxu0 %v7336_v9  ;;  %4692 = vmatpush3.msra.mxu1 %v7300_v18  ;;  %v7344_v18 = vld [vmem:[#allocation42_spill] sm:$0xff] }
  0xdc   :  { %4663 = vmatprep.subr.mxu0 %v7337_v46  ;;  %4693 = vmatprep.subr.mxu1 %v5919_v24  ;;  %v7345_v32 = vand.u32 4294901760, %v7344_v18  ;;  %v7346_v24 = vld [vmem:[#allocation41_spill] sm:$0xff] }
  0xdd   :  { %4664 = vmatpush3.msra.mxu0 %v7338_v56  ;;  %4694 = vmatpush3.msra.mxu1 %v7339_v11  ;;  %v7347_v51 = vand.u32 4294901760, %v7346_v24 }
  0xde   :  { %4665 = vmatprep.subr.mxu0 %v7340_v19  ;;  %4695 = vmatprep.subr.mxu1 %v7341_v2 }
  0xdf   :  { %4666 = vmatpush3.msra.mxu0 %v7342_v41  ;;  %4696 = vmatpush3.msra.mxu1 %v7343_v49 }
  0xe0   :  { %4667 = vmatprep.subr.mxu0 %v7345_v32  ;;  %4697 = vmatprep.subr.mxu1 %v5996_v38  ;;  %v7352_v38 = vld [vmem:[#allocation39_spill] sm:$0xff] }
  0xe1   :  { %4668 = vmatpush3.msra.mxu0 %v7347_v51  ;;  %1814 = vmatprep.mubr.f32.mxu0 %v7348_v47 }
  0xe2   :  { %4698 = vmatpush3.msra.mxu1 %v7349_v14  ;;  %1816 = vmatmul.mubr.f32.vlgmr.msra.gmra.mxu0 %v7350_v44 }
  0xe3   :  { %4699 = vmatprep.subr.mxu1 %v7303_v42  ;;  %1821 = vmatprep.mubr.f32.mxu0 %v7351_v63  ;;  %v1944_v42 = vld [vmem:[%s6941_s1 + $0x18] sm:$0xff] }
  0xe4   :  { %4700 = vmatpush3.msra.mxu1 %v5998_v58  ;;  %1925 = vmatprep.mubr.f32.mxu1 %v7348_v47  ;;  %v6437_v58 = vand.u32 4294901760, %v1944_v42 }
  0xe5   :  { %4701 = vmatprep.subr.mxu1 %v7306_v25 }
  0xe6   :  { %4702 = vmatpush3.msra.mxu1 %v6049_v37  ;;  %1823 = vmatmul.mubr.f32.gmra.mxu0 %v7352_v38  ;;  %v1943_v37 = vld [vmem:[%s6941_s1 + $0x10] sm:$0xff] }
  0xe7   :  { %4703 = vmatprep.subr.mxu1 %v6094_v59  ;;  %v6443_v59 = vsub.f32 %v1944_v42, %v6437_v58  ;;  %4767 = vmatprep.subr.mxu0 %v6437_v58 }
  0xe8   :  { %4704 = vmatpush3.msra.mxu1 %v6096_v4  ;;  %v6445_v4 = vand.u32 4294901760, %v1943_v37  ;;  %4768 = vmatpush3.msra.mxu0 %v6437_v58 }
  0xe9   :  { %4705 = vmatprep.subr.mxu1 %v6158_v33  ;;  %v1942_v33 = vld [vmem:[%s6941_s1 + $0x8] sm:$0xff]  ;;  %v6453_v25 = vand.u32 4294901760, %v6443_v59 }
  0xea   :  { %4706 = vmatpush3.msra.mxu1 %v7312_v40  ;;  %v6456_v43 = vsub.f32 %v1943_v37, %v6445_v4  ;;  %v6458_v16 = vand.u32 4294901760, %v1942_v33  ;;  %4769 = vmatprep.subr.mxu0 %v6445_v4  ;;  %v2098_v40 = vand.u32 4294901760, %v2097_v35 }
  0xeb   :  { %1927 = vmatmul.mubr.f32.vlgmr.msra.gmra.mxu1 %v7350_v44  ;;  %4770 = vmatpush3.msra.mxu0 %v6445_v4  ;;  %v2076_v55 = vsub.f32 %v6443_v59, %v6453_v25 }
  0xec   :  { %1932 = vmatprep.mubr.f32.mxu1 %v7351_v63  ;;  %v6468_v62 = vand.u32 4294901760, %v6456_v43  ;;  %v6471_v61 = vsub.f32 %v1942_v33, %v6458_v16  ;;  %4771 = vmatprep.subr.mxu0 %v6458_v16 }
  0xed   :  { %4772 = vmatpush3.msra.mxu0 %v6458_v16  ;;  %v2077_v21 = vand.u32 4294901760, %v2076_v55 }
  0xee   :  { %v2083_v3 = vsub.f32 %v6456_v43, %v6468_v62  ;;  %v6480_v27 = vand.u32 4294901760, %v6471_v61  ;;  %4773 = vmatprep.subr.mxu0 %v6473_v6 }
  0xef   :  { %1934 = vmatmul.mubr.f32.gmra.mxu1 %v7352_v38  ;;  %4774 = vmatpush3.msra.mxu0 %v6473_v6  ;;  %v4289_v50 = vpop.f32.mrf.mxu0 }
  0xf0   :  { %4778 = vmatprep.subr.mxu1 %v2077_v21  ;;  %v2084_v52 = vand.u32 4294901760, %v2083_v3  ;;  %v2090_v30 = vsub.f32 %v6471_v61, %v6480_v27  ;;  %4789 = vmatprep.subr.mxu0 %v6443_v59 }
  0xf1   :  { %4779 = vmatpush3.msra.mxu1 %v2077_v21  ;;  %v4290_v29 = vpop.f32.mrf.mxu0 }
  0xf2   :  { %4780 = vmatprep.subr.mxu1 %v2084_v52  ;;  %v2091_v60 = vand.u32 4294901760, %v2090_v30  ;;  %v4291_v51 = vadd.f32 %v4290_v29, %v4289_v50 }
  0xf3   :  { %4781 = vmatpush3.msra.mxu1 %v2084_v52 }
  0xf4   :  { %4782 = vmatprep.subr.mxu1 %v2091_v60 }
  0xf5   :  { %4783 = vmatpush3.msra.mxu1 %v2091_v60 }
  0xf6   :  { %4784 = vmatprep.subr.mxu1 %v2098_v40 }
  0xf7   :  { %4785 = vmatpush3.msra.mxu1 %v2098_v40  ;;  %v4327_v53 = vpop.f32.mrf.mxu1 }
  0xf8   :  { %4800 = vmatprep.subr.mxu1 %v6437_v58 }
  0xf9   :  { %v4328_v15 = vpop.f32.mrf.mxu1 }
  0xfa   :  { %v4329_v32 = vadd.f32 %v4328_v15, %v4327_v53 }
  0xfc   :  { %v459_v38 = vadd.f32 %v4329_v32, %v4291_v51 }
 0x10c   :  { %v4292_v45 = vpop.f32.mrf.mxu0 }
 0x10e   :  { %v4293_v26 = vpop.f32.mrf.mxu0 }
 0x10f   :  { %v4294_v47 = vadd.f32 %v4293_v26, %v4292_v45 }
 0x111   :  { %v4365_v10 = vpop.f32.mrf.mxu0 }
 0x113   :  { %v4330_v39 = vpop.f32.mrf.mxu1  ;;  %v4366_v34 = vpop.f32.mrf.mxu0 }
 0x114   :  { %v4367_v14 = vadd.f32 %v4366_v34, %v4365_v10 }
 0x115   :  { %v4331_v22 = vpop.f32.mrf.mxu1 }
 0x116   :  { %v4332_v44 = vadd.f32 %v4331_v22, %v4330_v39  ;;  %v604_v13 = vadd.f32 %v4367_v14, %v459_v38 }
 0x117   :  { %v4368_v48 = vpop.f32.mrf.mxu0 }
 0x118   :  { %v466_v55 = vadd.f32 %v4332_v44, %v4294_v47 }
 0x119   :  { %v4369_v12 = vpop.f32.mrf.mxu0 }
 0x11a   :  { %v4370_v21 = vadd.f32 %v4369_v12, %v4368_v48 }
 0x11c   :  { %v4403_v28 = vpop.f32.mrf.mxu1  ;;  %v613_v53 = vadd.f32 %v4370_v21, %v466_v55 }
 0x11e   :  { %v4404_v17 = vpop.f32.mrf.mxu1 }
 0x11f   :  { %v4405_v42 = vadd.f32 %v4404_v17, %v4403_v28 }
 0x121   :  { %v4406_v7 = vpop.f32.mrf.mxu1  ;;  %v721_v52 = vadd.f32 %v4405_v42, %v604_v13 }
 0x123   :  { %v4407_v8 = vpop.f32.mrf.mxu1 }
 0x124   :  { %v4408_v30 = vadd.f32 %v4407_v8, %v4406_v7 }
 0x126   :  { %v732_v26 = vadd.f32 %v4408_v30, %v613_v53 }
 0x136   :  { %v4441_v20 = vpop.f32.mrf.mxu0 }
 0x138   :  { %v4442_v31 = vpop.f32.mrf.mxu0 }
 0x139   :  { %v4443_v3 = vadd.f32 %v4442_v31, %v4441_v20 }
 0x13b   :  { %v4444_v57 = vpop.f32.mrf.mxu0  ;;  %v900_v15 = vadd.f32 %v4443_v3, %v721_v52 }
 0x13d   :  { %v4445_v54 = vpop.f32.mrf.mxu0 }
 0x13e   :  { %v4446_v50 = vadd.f32 %v4445_v54, %v4444_v57 }
 0x140   :  { %v4479_v1 = vpop.f32.mrf.mxu1  ;;  %v907_v17 = vadd.f32 %v4446_v50, %v732_v26 }
 0x142   :  { %v4480_v5 = vpop.f32.mrf.mxu1 }
 0x143   :  { %v4481_v60 = vadd.f32 %v4480_v5, %v4479_v1 }
 0x144   :  { %v4482_v9 = vpop.f32.mrf.mxu1 }
 0x145   :  { %v1011_v10 = vadd.f32 %v4481_v60, %v900_v15 }
 0x146   :  { %v4483_v56 = vpop.f32.mrf.mxu1 }
 0x147   :  { %v4484_v39 = vadd.f32 %v4483_v56, %v4482_v9 }
 0x149   :  { %v1018_v7 = vadd.f32 %v4484_v39, %v907_v17 }
 0x15a   :  { %v4517_v0 = vpop.f32.mrf.mxu0 }
 0x15c   :  { %v4518_v46 = vpop.f32.mrf.mxu0 }
 0x15d   :  { %v4519_v29 = vadd.f32 %v4518_v46, %v4517_v0 }
 0x15f   :  { %v1130_v32 = vadd.f32 %v4519_v29, %v1011_v10 }
 0x160   :  { %v4520_v11 = vpop.f32.mrf.mxu0 }
 0x162   :  { %v4521_v2 = vpop.f32.mrf.mxu0 }
 0x163   :  { %v4522_v48 = vadd.f32 %v4521_v2, %v4520_v11 }
 0x164   :  { %v4555_v19 = vpop.f32.mrf.mxu1 }
 0x165   :  { %v1145_v51 = vadd.f32 %v4522_v48, %v1018_v7 }
 0x166   :  { %v4556_v41 = vpop.f32.mrf.mxu1 }
 0x167   :  { %v4557_v34 = vadd.f32 %v4556_v41, %v4555_v19 }
 0x169   :  { %v1377_v31 = vadd.f32 %v4557_v34, %v1130_v32 }
 0x16a   :  { %v4558_v18 = vpop.f32.mrf.mxu1 }
 0x16c   :  { %v4559_v63 = vpop.f32.mrf.mxu1 }
 0x16d   :  { %v4560_v8 = vadd.f32 %v4559_v63, %v4558_v18 }
 0x16f   :  { %v1384_v9 = vadd.f32 %v4560_v8, %v1145_v51 }
 0x17e   :  { %v4593_v49 = vpop.f32.mrf.mxu0 }
 0x180   :  { %v4594_v24 = vpop.f32.mrf.mxu0 }
 0x181   :  { %v4595_v12 = vadd.f32 %v4594_v24, %v4593_v49 }
 0x183   :  { %v1522_v57 = vadd.f32 %v4595_v12, %v1377_v31 }
 0x184   :  { %v4596_v37 = vpop.f32.mrf.mxu0 }
 0x186   :  { %v4597_v35 = vpop.f32.mrf.mxu0 }
 0x187   :  { %v4598_v54 = vadd.f32 %v4597_v35, %v4596_v37 }
 0x188   :  { %v4631_v33 = vpop.f32.mrf.mxu1 }
 0x189   :  { %v1531_v14 = vadd.f32 %v4598_v54, %v1384_v9 }
 0x18a   :  { %v4632_v40 = vpop.f32.mrf.mxu1 }
 0x18b   :  { %v4633_v1 = vadd.f32 %v4632_v40, %v4631_v33 }
 0x18d   :  { %v1639_v56 = vadd.f32 %v4633_v1, %v1522_v57  ;;  %v2490_v1 = vstv %s6947_s7 }
 0x18e   :  { %v4634_v22 = vpop.f32.mrf.mxu1 }
 0x190   :  { %v4635_v5 = vpop.f32.mrf.mxu1 }
 0x191   :  { %v4636_v19 = vadd.f32 %v4635_v5, %v4634_v22 }
 0x193   :  { %v1650_v24 = vadd.f32 %v4636_v19, %v1531_v14 }
 0x1a2   :  { %v4669_v45 = vpop.f32.mrf.mxu0 }
 0x1a4   :  { %v4670_v28 = vpop.f32.mrf.mxu0 }
 0x1a5   :  { %v4671_v0 = vadd.f32 %v4670_v28, %v4669_v45 }
 0x1a6   :  { %v4672_v20 = vpop.f32.mrf.mxu0 }
 0x1a7   :  { %v1818_v44 = vadd.f32 %v4671_v0, %v1639_v56 }
 0x1a8   :  { %v4673_v46 = vpop.f32.mrf.mxu0 }
 0x1a9   :  { %v4674_v11 = vadd.f32 %v4673_v46, %v4672_v20 }
 0x1ab   :  { %v4707_v47 = vpop.f32.mrf.mxu1  ;;  %v1825_v63 = vadd.f32 %v4674_v11, %v1650_v24 }
 0x1ad   :  { %v4708_v41 = vpop.f32.mrf.mxu1 }
 0x1ae   :  { %v4709_v2 = vadd.f32 %v4708_v41, %v4707_v47 }
 0x1af   :  { %v4710_v49 = vpop.f32.mrf.mxu1 }
 0x1b0   :  { %v1929_v38 = vadd.f32 %v4709_v2, %v1818_v44 }
 0x1b1   :  { %v4711_v18 = vpop.f32.mrf.mxu1 }
 0x1b2   :  { %v1939_v42 = vmul.f32 0.0625, %v1929_v38  ;;  %v4712_v33 = vadd.f32 %v4711_v18, %v4710_v49 }
 0x1b4   :  { %v1954_v37 = vsel %vm1952_vm0, %v1939_v42, 0  ;;  %v1936_v13 = vadd.f32 %v4712_v33, %v1825_v63  ;;  %v3028_v33 = vld [vmem:[%s6946_s6 + $0x68] sm:$0xff] }
 0x1b5   :  { %v2028_v55 = vand.u32 4294901760, %v1954_v37 }
 0x1b6   :  { %v1940_v21 = vmul.f32 0.0625, %v1936_v13  ;;  %v3027_v13 = vld [vmem:[%s6946_s6 + $0x60] sm:$0xff] }
 0x1b7   :  { %v2029_v3 = vsub.f32 %v1954_v37, %v2028_v55  ;;  %4786 = vmatprep.mubr.f32.mxu1 %v2028_v55  ;;  %v6551_v37 = vand.u32 4294901760, %v3028_v33 }
 0x1b8   :  { %v1957_v52 = vsel %vm1952_vm0, %v1940_v21, 0  ;;  %v3024_v21 = vld [vmem:[%s6946_s6 + $0x48] sm:$0xff] }
 0x1b9   :  { %v2038_v30 = vand.u32 4294901760, %v1957_v52  ;;  %v2030_v60 = vand.u32 4294901760, %v2029_v3 }
 0x1bb   :  { %v2039_v35 = vsub.f32 %v1957_v52, %v2038_v30  ;;  %4787 = vmatmul.mubr.f32.vlgmr.msra.gmra.mxu1 %v2038_v30  ;;  %v2031_v40 = vsub.f32 %v2029_v3, %v2030_v60  ;;  %v6564_v52 = vand.u32 4294901760, %v3024_v21 }
 0x1bc   :  { %4801 = vmatpush3.msra.mxu1 %v6437_v58  ;;  %4808 = vmatprep.mubr.f32.mxu1 %v2030_v60 }
 0x1bd   :  { %4802 = vmatprep.subr.mxu1 %v6445_v4  ;;  %v2032_v53 = vand.u32 4294901760, %v2031_v40  ;;  %v2040_v15 = vand.u32 4294901760, %v2039_v35  ;;  %v3020_v40 = vld [vmem:[%s6946_s6 + $0x28] sm:$0xff] }
 0x1be   :  { %4803 = vmatpush3.msra.mxu1 %v6445_v4 }
 0x1bf   :  { %4804 = vmatprep.subr.mxu1 %v6458_v16  ;;  %4775 = vmatprep.mubr.f32.mxu0 %v2032_v53  ;;  %v2041_v50 = vsub.f32 %v2039_v35, %v2040_v15 }
 0x1c0   :  { %4805 = vmatpush3.msra.mxu1 %v6458_v16 }
 0x1c1   :  { %4806 = vmatprep.subr.mxu1 %v6473_v6  ;;  %v2042_v29 = vand.u32 4294901760, %v2041_v50  ;;  %v6583_v50 = vand.u32 4294901760, %v3020_v40 }
 0x1c2   :  { %4807 = vmatpush3.msra.mxu1 %v6473_v6 }
 0x1c3   :  { %4809 = vmatmul.mubr.f32.vlgmr.msra.gmra.mxu1 %v2040_v15  ;;  %4822 = vmatprep.subr.mxu1 %v6437_v58  ;;  %v6581_v15 = vsub.f32 %v3024_v21, %v6564_v52 }
 0x1c4   :  { %4776 = vmatmul.mubr.f32.vlgmr.msra.gmra.mxu0 %v2042_v29  ;;  %4823 = vmatpush3.msra.mxu1 %v6437_v58  ;;  %v2495_v58 = vld [vmem:[%s6943_s3] sm:$0xf] }
 0x1c5   :  { %4790 = vmatpush3.msra.mxu0 %v6443_v59  ;;  %4830 = vmatprep.mubr.f32.mxu1 %v2028_v55  ;;  %v2512_v59 = vsel %vm2510_vm1, %v2495_v58, 0  ;;  %v3019_v29 = vld [vmem:[%s6946_s6 + $0x20] sm:$0xff] }
 0x1c6   :  { %4791 = vmatprep.subr.mxu0 %v6456_v43  ;;  %4797 = vmatprep.mubr.f32.mxu0 %v2029_v3  ;;  %v6562_v3 = vsub.f32 %v3028_v33, %v6551_v37 }
 0x1c7   :  { %4824 = vmatprep.subr.mxu1 %v6445_v4  ;;  %4792 = vmatpush3.msra.mxu0 %v6456_v43 }
 0x1c8   :  { %4825 = vmatpush3.msra.mxu1 %v6445_v4  ;;  %4793 = vmatprep.subr.mxu0 %v6471_v61  ;;  %v2545_v4 = vand.u32 4294901760, %v2512_v59  ;;  %v3158_v53 = vand.u32 4294901760, %v6562_v3 }
 0x1c9   :  { %4826 = vmatprep.subr.mxu1 %v6458_v16  ;;  %4794 = vmatpush3.msra.mxu0 %v6471_v61 }
 0x1ca   :  { %4827 = vmatpush3.msra.mxu1 %v6458_v16  ;;  %4795 = vmatprep.subr.mxu0 %v6483_v36 }
 0x1cb   :  { %4828 = vmatprep.subr.mxu1 %v6473_v6  ;;  %4796 = vmatpush3.msra.mxu0 %v6483_v36 }
 0x1cc   :  { %4829 = vmatpush3.msra.mxu1 %v6473_v6  ;;  %4798 = vmatmul.mubr.f32.vlgmr.msra.gmra.mxu0 %v2039_v35  ;;  %v4253_v6 = vld [vmem:[%s6942_s2] ss:$0 sm:$0xff] }
 0x1cd   :  { %4811 = vmatprep.subr.mxu0 %v6453_v25  ;;  %4831 = vmatmul.mubr.f32.vlgmr.msra.gmra.mxu1 %v2038_v30 }
 0x1ce   :  { %4812 = vmatpush3.msra.mxu0 %v6453_v25  ;;  %4819 = vmatprep.mubr.f32.mxu0 %v2028_v55  ;;  %v6531_v25 = vsub.f32 %v2512_v59, %v2545_v4  ;;  %v6556_v55 = vand.u32 4294901760, %v3027_v13 }
 0x1cf   :  { %4813 = vmatprep.subr.mxu0 %v6468_v62 }
 0x1d0   :  { %4814 = vmatpush3.msra.mxu0 %v6468_v62  ;;  %v6534_v43 = vand.u32 4294901760, %v6531_v25  ;;  %v6571_v60 = vsub.f32 %v3027_v13, %v6556_v55 }
 0x1d1   :  { %4815 = vmatprep.subr.mxu0 %v6480_v27 }
 0x1d2   :  { %4816 = vmatpush3.msra.mxu0 %v6480_v27  ;;  %v2634_v16 = vsub.f32 %v6531_v25, %v6534_v43  ;;  %v3164_v58 = vand.u32 4294901760, %v6571_v60 }
 0x1d3   :  { %4817 = vmatprep.subr.mxu0 %v6490_v23 }
 0x1d4   :  { %4818 = vmatpush3.msra.mxu0 %v6490_v23  ;;  %v2635_v62 = vand.u32 4294901760, %v2634_v16  ;;  %v3170_v16 = vand.u32 4294901760, %v6581_v15 }
 0x1d5   :  { %4820 = vmatmul.mubr.f32.vlgmr.msra.gmra.mxu0 %v2038_v30  ;;  %4833 = vmatprep.subr.mxu0 %v2545_v4  ;;  %v3023_v30 = vld [vmem:[%s6946_s6 + $0x40] sm:$0xff] }
 0x1d6   :  { %4834 = vmatpush3.msra.mxu0 %v2545_v4  ;;  %4838 = vmatprep.subr.mxu1 %v2635_v62  ;;  %v6573_v35 = vand.u32 4294901760, %v3023_v30 }
 0x1d7   :  { %4843 = vmatprep.subr.mxu0 %v6531_v25  ;;  %4839 = vmatpush3.msra.mxu1 %v2635_v62  ;;  %v6604_v62 = vsub.f32 %v3020_v40, %v6583_v50 }
 0x1d8   :  { %4848 = vmatprep.subr.mxu1 %v2545_v4  ;;  %v6591_v59 = vsub.f32 %v3023_v30, %v6573_v35 }
 0x27b   :  { %v4788_v27 = vpop.f32.mrf.mxu1 }
 0x27d   :  { %v2135_v10 = vpop.f32.mrf.mxu1 }
 0x283   :  { %v4810_v34 = vpop.f32.mrf.mxu1 }
 0x284   :  { %v4777_v61 = vpop.f32.mrf.mxu0 }
 0x285   :  { %v2045_v23 = vadd.f32 %v4777_v61, %v4253_v6  ;;  %v2305_v48 = vpop.f32.mrf.mxu1 }
 0x286   :  { %v2034_v36 = vpop.f32.mrf.mxu0 }
 0x287   :  { %v2035_v45 = vadd.f32 %v4253_v6, %v2034_v36  ;;  %v2142_v39 = vadd.f32 %v4788_v27, %v2045_v23  ;;  %v3015_v6 = vld [vmem:[%s6946_s6] sm:$0xff]  ;;  %v3165_v27 = vsub.f32 %v6571_v60, %v3164_v58  ;;  %v3176_v36 = vand.u32 4294901760, %v6591_v59 }
 0x289   :  { %v2136_v17 = vadd.f32 %v2135_v10, %v2035_v45  ;;  %v6619_v45 = vand.u32 4294901760, %v3015_v6  ;;  %v3171_v10 = vsub.f32 %v6581_v15, %v3170_v16 }
 0x28c   :  { %v4799_v26 = vpop.f32.mrf.mxu0 }
 0x28d   :  { %v2229_v28 = vadd.f32 %v4799_v26, %v2142_v39  ;;  %v4832_v20 = vpop.f32.mrf.mxu1  ;;  %v3182_v39 = vand.u32 4294901760, %v6604_v62 }
 0x28e   :  { %v2221_v22 = vpop.f32.mrf.mxu0 }
 0x28f   :  { %v2222_v32 = vadd.f32 %v2221_v22, %v2136_v17  ;;  %v2314_v12 = vadd.f32 %v4810_v34, %v2229_v28  ;;  %v2477_v54 = vpop.f32.mrf.mxu1  ;;  %v3166_v22 = vand.u32 4294901760, %v3165_v27  ;;  %v3177_v28 = vsub.f32 %v6591_v59, %v3176_v36 }
 0x291   :  { %v2306_v8 = vadd.f32 %v2305_v48, %v2222_v32  ;;  %v6635_v32 = vsub.f32 %v3015_v6, %v6619_v45  ;;  %v3172_v48 = vand.u32 4294901760, %v3171_v10 }
 0x295   :  { %v4821_v7 = vpop.f32.mrf.mxu0 }
 0x296   :  { %v2403_v31 = vadd.f32 %v4821_v7, %v2314_v12  ;;  %v3183_v12 = vsub.f32 %v6604_v62, %v3182_v39  ;;  %v3178_v7 = vand.u32 4294901760, %v3177_v28 }
 0x297   :  { %v2396_v5 = vpop.f32.mrf.mxu0 }
 0x298   :  { %v2484_v51 = vadd.f32 %v4832_v20, %v2403_v31  ;;  %v2397_v57 = vadd.f32 %v2396_v5, %v2306_v8  ;;  %v3200_v8 = vand.u32 4294901760, %v6635_v32 }
 0x29a   :  { %vm2489_vm2 = vcmp.gt.f32.partialorder %v2484_v51, 0.0  ;;  %v2492_v0 = vmul.f32 %v2490_v1, %v2484_v51  ;;  %v2478_v46 = vadd.f32 %v2477_v54, %v2397_v57  ;;  %v3201_v57 = vsub.f32 %v6635_v32, %v3200_v8 }
 0x29c   :  { %v2494_v47 = vsel %vm2489_vm2, %v2484_v51, %v2492_v0  ;;  %vm2488_vm4 = vcmp.gt.f32.partialorder %v2478_v46, 0.0  ;;  %v2491_v9 = vmul.f32 %v2490_v1, %v2478_v46  ;;  %v3184_v1 = vand.u32 4294901760, %v3183_v12 }
 0x29d   :  { %v2508_v56 = vsel %vm2503_vm3, %v2494_v47, 0  ;;  %v3202_v0 = vand.u32 4294901760, %v3201_v57 }
 0x29e   :  { %v2493_v19 = vsel %vm2488_vm4, %v2478_v46, %v2491_v9  ;;  %v2590_v41 = vand.u32 4294901760, %v2508_v56  ;;  %v4905_v46 = vmov 0.0  }
 0x29f   :  { %v2505_v14 = vsel %vm2503_vm3, %v2493_v19, 0 }
 0x2a0   :  { %v2580_v44 = vand.u32 4294901760, %v2505_v14  ;;  %v2591_v11 = vsub.f32 %v2508_v56, %v2590_v41  ;;  %v4254_v56 = vld [vmem:[%s6944_s4] ss:$0 sm:$0xff]  ;;  %s4242_s4 = sshll.u32 %s4906_s20, 4  ;;  %s4243_s4 = int_to_ptr.vmem [resolvable:$true] %s4242_s4 }
 0x2a1   :  { %s4883_s24 = scalar_lea.vmem %s4243_s4, 1024  ;;  %p4888_p1 = scmp.lt.s32.totalorder %s4243_s4, %s4243_s4 }
 0x2a2   :  { %4840 = vmatprep.mubr.f32.mxu1 %v2580_v44  ;;  %v2581_v2 = vsub.f32 %v2505_v14, %v2580_v44  ;;  %v2592_v49 = vand.u32 4294901760, %v2591_v11  ;;  %p4884_p0 = scmp.ne.s32.totalorder %s4243_s4, %s4883_s24  ;;  %p4889_p2 = scmp.lt.s32.totalorder %s4883_s24, %s4883_s24 }
 0x2a3   :  { %4841 = vmatmul.mubr.f32.vlgmr.msra.gmra.mxu1 %v2590_v41 }
 0x2a4   :  { %4849 = vmatpush3.msra.mxu1 %v2545_v4  ;;  %v2582_v24 = vand.u32 4294901760, %v2581_v2  ;;  %v2593_v38 = vsub.f32 %v2591_v11, %v2592_v49  ;;  %p4890_p3 = por %p4889_p2, %p4888_p1 }
 0x2a5   :  { %4858 = vmatprep.subr.mxu1 %v2545_v4 }
 0x2a6   :  { %4850 = vmatprep.mubr.f32.mxu1 %v2582_v24  ;;  %v2583_v18 = vsub.f32 %v2581_v2, %v2582_v24  ;;  %v2594_v42 = vand.u32 4294901760, %v2593_v38  ;;  %p4891_p4 = pnand %p4890_p3, %p4884_p0 }
 0x2a7   :  { %4851 = vmatmul.mubr.f32.vlgmr.msra.gmra.mxu1 %v2592_v49 }
 0x2a8   :  { %4860 = vmatprep.mubr.f32.mxu1 %v2580_v44  ;;  %v2584_v63 = vand.u32 4294901760, %v2583_v18  ;;  %4859 = vmatpush3.msra.mxu1 %v2545_v4  ;;  %v6593_v4 = vand.u32 4294901760, %v3019_v29 }
 0x2aa   :  { %4835 = vmatprep.mubr.f32.mxu0 %v2584_v63  ;;  %v6617_v23 = vsub.f32 %v3019_v29, %v6593_v4 }
 0x2ab   :  { %4836 = vmatmul.mubr.f32.vlgmr.msra.gmra.mxu0 %v2594_v42  ;;  %4861 = vmatmul.mubr.f32.vlgmr.msra.gmra.mxu1 %v2590_v41 }
 0x2ac   :  { %4844 = vmatpush3.msra.mxu0 %v6531_v25  ;;  %4845 = vmatprep.mubr.f32.mxu0 %v2581_v2  ;;  %v3016_v25 = vld [vmem:[%s6946_s6 + $0x8] sm:$0xff]  ;;  %v3188_v17 = vand.u32 4294901760, %v6617_v23 }
 0x2ad   :  { %4853 = vmatprep.subr.mxu0 %v6534_v43  ;;  %v6606_v61 = vand.u32 4294901760, %v3016_v25  ;;  %3236 = vmatprep.mubr.f32.mxu1 %v4905_v46 }
 0x2ae   :  { %v3189_v31 = vsub.f32 %v6617_v23, %v3188_v17 }
 0x2af   :  { %4846 = vmatmul.mubr.f32.vlgmr.msra.gmra.mxu0 %v2591_v11  ;;  %v6627_v34 = vsub.f32 %v3016_v25, %v6606_v61 }
 0x2b0   :  { %4854 = vmatpush3.msra.mxu0 %v6534_v43  ;;  %4855 = vmatprep.mubr.f32.mxu0 %v2580_v44  ;;  %v3159_v43 = vsub.f32 %v6562_v3, %v3158_v53  ;;  %v3190_v51 = vand.u32 4294901760, %v3189_v31 }
 0x2b1   :  { %3062 = vmatprep.subr.mxu0 %v6551_v37  ;;  %v3194_v20 = vand.u32 4294901760, %v6627_v34 }
 0x2b2   :  { %v3160_v26 = vand.u32 4294901760, %v3159_v43 }
 0x2b3   :  { %4856 = vmatmul.mubr.f32.vlgmr.msra.gmra.mxu0 %v2590_v41  ;;  %v3195_v5 = vsub.f32 %v6627_v34, %v3194_v20 }
 0x2b4   :  { %3064 = vmatpush1.msra.mxu0 %v6556_v55  ;;  %3161 = vmatprep.subr.mxu1 %v3160_v26 }
 0x2b5   :  { %3066 = vmatprep.subr.mxu0 %v6564_v52  ;;  %3167 = vmatpush1.msra.mxu1 %v3166_v22  ;;  %v3196_v54 = vand.u32 4294901760, %v3195_v5 }
 0x2b6   :  { %3068 = vmatpush1.msra.mxu0 %v6573_v35  ;;  %3173 = vmatprep.subr.mxu1 %v3172_v48 }
 0x2b7   :  { %3070 = vmatprep.subr.mxu0 %v6583_v50  ;;  %3179 = vmatpush1.msra.mxu1 %v3178_v7 }
 0x2b8   :  { %3072 = vmatpush1.msra.mxu0 %v6593_v4  ;;  %3185 = vmatprep.subr.mxu1 %v3184_v1 }
 0x2b9   :  { %3074 = vmatprep.subr.mxu0 %v6606_v61  ;;  %3191 = vmatpush1.msra.mxu1 %v3190_v51 }
 0x2ba   :  { %3076 = vmatpush1.msra.mxu0 %v6619_v45  ;;  %3197 = vmatprep.subr.mxu1 %v3196_v54  ;;  %v3030_v54 = vld [vmem:[%s6946_s6 + $0x78] sm:$0xff] }
 0x2bb   :  { %3277 = vmatprep.subr.mxu0 %v6562_v3  ;;  %3203 = vmatpush1.msra.mxu1 %v3202_v0  ;;  %v3029_v0 = vld [vmem:[%s6946_s6 + $0x70] sm:$0xff] }
 0x2bc   :  { %3373 = vmatprep.subr.mxu1 %v6551_v37  ;;  %3109 = vmatprep.mubr.f32.mxu0 %v4905_v46 }
 0x363   :  { %v4842_v47 = vpop.f32.mrf.mxu1 }
 0x365   :  { %v2672_v9 = vpop.f32.mrf.mxu1 }
 0x367   :  { %v4852_v19 = vpop.f32.mrf.mxu1 }
 0x369   :  { %v2833_v49 = vpop.f32.mrf.mxu1 }
 0x36b   :  { %v4837_v41 = vpop.f32.mrf.mxu0  ;;  %v4862_v13 = vpop.f32.mrf.mxu1 }
 0x36c   :  { %v2597_v14 = vadd.f32 %v4837_v41, %v4254_v56 }
 0x36d   :  { %v2586_v44 = vpop.f32.mrf.mxu0  ;;  %v2993_v6 = vpop.f32.mrf.mxu1 }
 0x36e   :  { %v2587_v11 = vadd.f32 %v4254_v56, %v2586_v44  ;;  %v2679_v2 = vadd.f32 %v4842_v47, %v2597_v14  ;;  %v3026_v56 = vld [vmem:[%s6946_s6 + $0x58] sm:$0xff]  ;;  %v6689_v14 = vand.u32 4294901760, %v3029_v0  ;;  %v3025_v44 = vld [vmem:[%s6946_s6 + $0x50] sm:$0xff] }
 0x36f   :  { %v4847_v24 = vpop.f32.mrf.mxu0 }
 0x370   :  { %v2760_v38 = vadd.f32 %v4847_v24, %v2679_v2  ;;  %v2673_v18 = vadd.f32 %v2672_v9, %v2587_v11  ;;  %v6695_v11 = vand.u32 4294901760, %v3026_v56  ;;  %v3022_v24 = vld [vmem:[%s6946_s6 + $0x38] sm:$0xff] }
 0x371   :  { %v2752_v63 = vpop.f32.mrf.mxu0 }
 0x372   :  { %v2753_v42 = vadd.f32 %v2752_v63, %v2673_v18  ;;  %v2842_v33 = vadd.f32 %v4852_v19, %v2760_v38  ;;  %v6683_v19 = vand.u32 4294901760, %v3030_v54  ;;  %v6712_v18 = vand.u32 4294901760, %v3025_v44  ;;  %v3021_v63 = vld [vmem:[%s6946_s6 + $0x30] sm:$0xff] }
 0x373   :  { %v4857_v21 = vpop.f32.mrf.mxu0 }
 0x374   :  { %v2922_v30 = vadd.f32 %v4857_v21, %v2842_v33  ;;  %v2834_v40 = vadd.f32 %v2833_v49, %v2753_v42  ;;  %v6710_v38 = vsub.f32 %v3030_v54, %v6683_v19  ;;  %v6721_v33 = vsub.f32 %v3029_v0, %v6689_v14 }
 0x375   :  { %v2915_v29 = vpop.f32.mrf.mxu0  ;;  %v6728_v21 = vsub.f32 %v3026_v56, %v6695_v11 }
 0x376   :  { %v3000_v25 = vadd.f32 %v4862_v13, %v2922_v30  ;;  %v2916_v43 = vadd.f32 %v2915_v29, %v2834_v40  ;;  %v3018_v13 = vld [vmem:[%s6946_s6 + $0x18] sm:$0xff]  ;;  %v6730_v30 = vand.u32 4294901760, %v3022_v24  ;;  %v6736_v29 = vand.u32 4294901760, %v3021_v63 }
 0x378   :  { %v4256_v27 = vmul.f32 -1.442695, %v3000_v25  ;;  %v2994_v26 = vadd.f32 %v2993_v6, %v2916_v43  ;;  %v3017_v25 = vld [vmem:[%s6946_s6 + $0x10] sm:$0xff]  ;;  %v3750_v43 = vand.u32 4294901760, %v6710_v38  ;;  %v6745_v6 = vsub.f32 %v3025_v44, %v6712_v18 }
 0x37a   :  { %4867 = vpow2.f32 %v4256_v27  ;;  %v4255_v10 = vmul.f32 -1.442695, %v2994_v26  ;;  %v6747_v27 = vand.u32 4294901760, %v3018_v13  ;;  %v3756_v26 = vand.u32 4294901760, %v6721_v33 }
 0x37c   :  { %4869 = vpow2.f32 %v4255_v10  ;;  %v3762_v10 = vand.u32 4294901760, %v6728_v21 }
 0x387   :  { %v4868_v22 = vpop.eup %4867 }
 0x388   :  { %v3010_v28 = vadd.f32 1.0, %v4868_v22  ;;  %v6758_v22 = vand.u32 4294901760, %v3017_v25 }
 0x389   :  { %v4870_v48 = vpop.eup %4869 }
 0x38a   :  { %4871 = vrcp.f32 %v3010_v28  ;;  %v3009_v12 = vadd.f32 1.0, %v4870_v48  ;;  %v3768_v48 = vand.u32 4294901760, %v6745_v6 }
 0x38c   :  { %4873 = vrcp.f32 %v3009_v12  ;;  %v6774_v12 = vsub.f32 %v3018_v13, %v6747_v27  ;;  %v3769_v54 = vsub.f32 %v6745_v6, %v3768_v48 }
 0x38e   :  { %v3786_v0 = vand.u32 4294901760, %v6774_v12 }
 0x397   :  { %v4872_v7 = vpop.eup %4871 }
 0x398   :  { %v3035_v31 = vsel %vm1952_vm0, %v4872_v7, 0  ;;  %v3757_v7 = vsub.f32 %v6721_v33, %v3756_v26 }
 0x399   :  { %v4874_v1 = vpop.eup %4873  ;;  %v6660_v5 = vand.u32 4294901760, %v3035_v31 }
 0x39a   :  { %v3032_v51 = vsel %vm1952_vm0, %v4874_v1, 0  ;;  %v6788_v1 = vsub.f32 %v3017_v25, %v6758_v22  ;;  %v3758_v56 = vand.u32 4294901760, %v3757_v7 }
 0x39b   :  { %v6663_v57 = vand.u32 4294901760, %v3032_v51  ;;  %v6676_v9 = vsub.f32 %v3035_v31, %v6660_v5 }
 0x39c   :  { %v3792_v44 = vand.u32 4294901760, %v6788_v1 }
 0x39d   :  { %3238 = vmatmul.mubr.f32.vlgmr.msra.gmra.mxu1 %v6663_v57  ;;  %v6673_v47 = vsub.f32 %v3032_v51, %v6663_v57  ;;  %v6702_v49 = vand.u32 4294901760, %v6676_v9 }
 0x39e   :  { %3375 = vmatpush1.msra.mxu1 %v6556_v55  ;;  %3243 = vmatprep.mubr.f32.mxu1 %v4905_v46 }
 0x39f   :  { %3377 = vmatprep.subr.mxu1 %v6564_v52  ;;  %v6687_v41 = vand.u32 4294901760, %v6673_v47  ;;  %v3124_v40 = vsub.f32 %v6676_v9, %v6702_v49 }
 0x3a0   :  { %3379 = vmatpush1.msra.mxu1 %v6573_v35 }
 0x3a1   :  { %3245 = vmatmul.mubr.f32.gmra.mxu1 %v6660_v5  ;;  %3381 = vmatprep.subr.mxu1 %v6583_v50  ;;  %v3113_v2 = vsub.f32 %v6673_v47, %v6687_v41  ;;  %v6762_v28 = vand.u32 4294901760, %v3124_v40 }
 0x3a2   :  { %3383 = vmatpush1.msra.mxu1 %v6593_v4  ;;  %3420 = vmatprep.mubr.f32.mxu1 %v4905_v46 }
 0x3a3   :  { %3385 = vmatprep.subr.mxu1 %v6606_v61  ;;  %v6718_v42 = vand.u32 4294901760, %v3113_v2 }
 0x3a4   :  { %3387 = vmatpush1.msra.mxu1 %v6619_v45 }
 0x3a5   :  { %3115 = vmatmul.mubr.f32.vlgmr.msra.gmra.mxu0 %v6718_v42  ;;  %3424 = vmatmul.mubr.f32.vlgmr.msra.gmra.mxu1 %v6687_v41 }
 0x3a6   :  { %3280 = vmatpush1.msra.mxu0 %v6571_v60  ;;  %3567 = vmatprep.subr.mxu1 %v6551_v37  ;;  %v6756_v37 = vsub.f32 %v3022_v24, %v6730_v30  ;;  %v3793_v60 = vsub.f32 %v6788_v1, %v3792_v44 }
 0x3a7   :  { %3283 = vmatprep.subr.mxu0 %v6581_v15  ;;  %3569 = vmatpush1.msra.mxu1 %v6556_v55  ;;  %v6765_v55 = vsub.f32 %v3021_v63, %v6736_v29 }
 0x3a8   :  { %3286 = vmatpush1.msra.mxu0 %v6591_v59  ;;  %3571 = vmatprep.subr.mxu1 %v6564_v52  ;;  %v3751_v52 = vsub.f32 %v6710_v38, %v3750_v43  ;;  %v3774_v31 = vand.u32 4294901760, %v6756_v37  ;;  %v3794_v59 = vand.u32 4294901760, %v3793_v60 }
 0x3a9   :  { %3120 = vmatprep.mubr.f32.mxu0 %v4905_v46  ;;  %3289 = vmatprep.subr.mxu0 %v6604_v62  ;;  %v3780_v51 = vand.u32 4294901760, %v6765_v55 }
 0x3aa   :  { %3429 = vmatprep.mubr.f32.mxu1 %v4905_v46  ;;  %3573 = vmatpush1.msra.mxu1 %v6573_v35  ;;  %v3763_v35 = vsub.f32 %v6728_v21, %v3762_v10 }
 0x3ab   :  { %3126 = vmatmul.mubr.f32.gmra.mxu0 %v6762_v28  ;;  %3433 = vmatmul.mubr.f32.gmra.mxu1 %v6702_v49  ;;  %v3781_v3 = vsub.f32 %v6765_v55, %v3780_v51 }
 0x3ac   :  { %3292 = vmatpush1.msra.mxu0 %v6617_v23  ;;  %3575 = vmatprep.subr.mxu1 %v6583_v50  ;;  %v3752_v50 = vand.u32 4294901760, %v3751_v52 }
 0x3ad   :  { %3295 = vmatprep.subr.mxu0 %v6627_v34  ;;  %3577 = vmatpush1.msra.mxu1 %v6593_v4  ;;  %v3764_v4 = vand.u32 4294901760, %v3763_v35 }
 0x3ae   :  { %3298 = vmatpush1.msra.mxu0 %v6635_v32  ;;  %3579 = vmatprep.subr.mxu1 %v6606_v61  ;;  %v3775_v61 = vsub.f32 %v6756_v37, %v3774_v31 }
 0x3af   :  { %3331 = vmatprep.mubr.f32.mxu0 %v4905_v46  ;;  %3466 = vmatprep.subr.mxu0 %v3158_v53  ;;  %v3770_v53 = vand.u32 4294901760, %v3769_v54 }
 0x3b0   :  { %3581 = vmatpush1.msra.mxu1 %v6619_v45  ;;  %3614 = vmatprep.mubr.f32.mxu1 %v4905_v46  ;;  %v3787_v45 = vsub.f32 %v6774_v12, %v3786_v0  ;;  %v3776_v2 = vand.u32 4294901760, %v3775_v61 }
 0x3b1   :  { %3334 = vmatmul.mubr.f32.vlgmr.msra.gmra.mxu0 %v6673_v47  ;;  %3616 = vmatmul.mubr.f32.vlgmr.msra.gmra.mxu1 %v6663_v57 }
 0x3b2   :  { %3470 = vmatpush1.msra.mxu0 %v3164_v58  ;;  %3753 = vmatprep.subr.mxu1 %v3752_v50  ;;  %v3782_v58 = vand.u32 4294901760, %v3781_v3  ;;  %v3788_v15 = vand.u32 4294901760, %v3787_v45  ;;  %v4878_v3 = vld [vmem:[%s6940_s0 + $0x28] sm:$0xff] }
 0x3b3   :  { %3474 = vmatprep.subr.mxu0 %v3170_v16  ;;  %3759 = vmatpush1.msra.mxu1 %v3758_v56 }
 0x3b4   :  { %3478 = vmatpush1.msra.mxu0 %v3176_v36  ;;  %3765 = vmatprep.subr.mxu1 %v3764_v4 }
 0x3b5   :  { %3339 = vmatprep.mubr.f32.mxu0 %v4905_v46  ;;  %3482 = vmatprep.subr.mxu0 %v3182_v39 }
 0x3b6   :  { %3621 = vmatprep.mubr.f32.mxu1 %v4905_v46  ;;  %3771 = vmatpush1.msra.mxu1 %v3770_v53 }
 0x3b7   :  { %3342 = vmatmul.mubr.f32.gmra.mxu0 %v6676_v9  ;;  %3623 = vmatmul.mubr.f32.gmra.mxu1 %v6660_v5 }
 0x3b8   :  { %3486 = vmatpush1.msra.mxu0 %v3188_v17  ;;  %3777 = vmatprep.subr.mxu1 %v3776_v2 }
 0x3b9   :  { %3490 = vmatprep.subr.mxu0 %v3194_v20  ;;  %3783 = vmatpush1.msra.mxu1 %v3782_v58 }
 0x3ba   :  { %3494 = vmatpush1.msra.mxu0 %v3200_v8  ;;  %3789 = vmatprep.subr.mxu1 %v3788_v15 }
 0x3bb   :  { %3527 = vmatprep.mubr.f32.mxu0 %v4905_v46  ;;  %3654 = vmatprep.subr.mxu0 %v6683_v19 }
 0x3bc   :  { %3795 = vmatpush1.msra.mxu1 %v3794_v59  ;;  %3828 = vmatprep.mubr.f32.mxu1 %v4905_v46 }
 0x3bd   :  { %3529 = vmatmul.mubr.f32.vlgmr.msra.gmra.mxu0 %v6663_v57  ;;  %3830 = vmatmul.mubr.f32.vlgmr.msra.gmra.mxu1 %v6663_v57 }
 0x3be   :  { %3656 = vmatpush1.msra.mxu0 %v6689_v14  ;;  %3965 = vmatprep.subr.mxu1 %v6683_v19 }
 0x3bf   :  { %3658 = vmatprep.subr.mxu0 %v6695_v11  ;;  %3967 = vmatpush1.msra.mxu1 %v6689_v14 }
 0x3c0   :  { %3660 = vmatpush1.msra.mxu0 %v6712_v18  ;;  %3969 = vmatprep.subr.mxu1 %v6695_v11 }
 0x3c1   :  { %3534 = vmatprep.mubr.f32.mxu0 %v4905_v46  ;;  %3662 = vmatprep.subr.mxu0 %v6730_v30 }
 0x3c2   :  { %3835 = vmatprep.mubr.f32.mxu1 %v4905_v46  ;;  %3971 = vmatpush1.msra.mxu1 %v6712_v18 }
 0x3c3   :  { %3536 = vmatmul.mubr.f32.gmra.mxu0 %v6660_v5  ;;  %3837 = vmatmul.mubr.f32.gmra.mxu1 %v6660_v5 }
 0x3c4   :  { %3664 = vmatpush1.msra.mxu0 %v6736_v29  ;;  %3973 = vmatprep.subr.mxu1 %v6730_v30 }
 0x3c5   :  { %3666 = vmatprep.subr.mxu0 %v6747_v27  ;;  %3975 = vmatpush1.msra.mxu1 %v6736_v29 }
 0x3c6   :  { %3668 = vmatpush1.msra.mxu0 %v6758_v22  ;;  %3977 = vmatprep.subr.mxu1 %v6747_v27 }
 0x3c7   :  { %3701 = vmatprep.mubr.f32.mxu0 %v4905_v46  ;;  %3869 = vmatprep.subr.mxu0 %v6710_v38 }
 0x3c8   :  { %3979 = vmatpush1.msra.mxu1 %v6758_v22  ;;  %4012 = vmatprep.mubr.f32.mxu1 %v4905_v46 }
 0x3c9   :  { %3707 = vmatmul.mubr.f32.vlgmr.msra.gmra.mxu0 %v6718_v42  ;;  %4016 = vmatmul.mubr.f32.vlgmr.msra.gmra.mxu1 %v6687_v41 }
 0x3ca   :  { %3872 = vmatpush1.msra.mxu0 %v6721_v33  ;;  %4159 = vmatprep.subr.mxu1 %v6683_v19 }
 0x3cb   :  { %3875 = vmatprep.subr.mxu0 %v6728_v21  ;;  %4161 = vmatpush1.msra.mxu1 %v6689_v14 }
 0x3cc   :  { %3878 = vmatpush1.msra.mxu0 %v6745_v6  ;;  %4163 = vmatprep.subr.mxu1 %v6695_v11 }
 0x3cd   :  { %3712 = vmatprep.mubr.f32.mxu0 %v4905_v46  ;;  %3881 = vmatprep.subr.mxu0 %v6756_v37  ;;  %v4875_v37 = vld [vmem:[%s6940_s0] sm:$0xff] }
 0x3ce   :  { %4021 = vmatprep.mubr.f32.mxu1 %v4905_v46  ;;  %4165 = vmatpush1.msra.mxu1 %v6712_v18 }
 0x3cf   :  { %3718 = vmatmul.mubr.f32.gmra.mxu0 %v6762_v28  ;;  %4025 = vmatmul.mubr.f32.gmra.mxu1 %v6702_v49 }
 0x3d0   :  { %3884 = vmatpush1.msra.mxu0 %v6765_v55  ;;  %4167 = vmatprep.subr.mxu1 %v6730_v30 }
 0x3d1   :  { %3887 = vmatprep.subr.mxu0 %v6774_v12  ;;  %4169 = vmatpush1.msra.mxu1 %v6736_v29  ;;  %v4876_v12 = vld [vmem:[%s6940_s0 + $0x8] sm:$0xff] }
 0x3d2   :  { %3890 = vmatpush1.msra.mxu0 %v6788_v1  ;;  %4171 = vmatprep.subr.mxu1 %v6747_v27 }
 0x3d3   :  { %3923 = vmatprep.mubr.f32.mxu0 %v4905_v46  ;;  %4058 = vmatprep.subr.mxu0 %v3750_v43 }
 0x3d4   :  { %4173 = vmatpush1.msra.mxu1 %v6758_v22  ;;  %4206 = vmatprep.mubr.f32.mxu1 %v4905_v46 }
 0x3d5   :  { %3926 = vmatmul.mubr.f32.vlgmr.msra.gmra.mxu0 %v6673_v47  ;;  %4208 = vmatmul.mubr.f32.vlgmr.msra.gmra.mxu1 %v6663_v57 }
 0x3d6   :  { %4062 = vmatpush1.msra.mxu0 %v3756_v26  ;;  %3931 = vmatprep.mubr.f32.mxu0 %v4905_v46 }
 0x3d7   :  { %4066 = vmatprep.subr.mxu0 %v3762_v10  ;;  %4213 = vmatprep.mubr.f32.mxu1 %v4905_v46 }
 0x3d8   :  { %4070 = vmatpush1.msra.mxu0 %v3768_v48 }
 0x3d9   :  { %4074 = vmatprep.subr.mxu0 %v3774_v31  ;;  %3934 = vmatmul.mubr.f32.gmra.mxu0 %v6676_v9 }
 0x3da   :  { %4078 = vmatpush1.msra.mxu0 %v3780_v51  ;;  %4215 = vmatmul.mubr.f32.gmra.mxu1 %v6660_v5 }
 0x3db   :  { %4082 = vmatprep.subr.mxu0 %v3786_v0  ;;  %4119 = vmatprep.mubr.f32.mxu0 %v4905_v46  ;;  %v4877_v0 = vld [vmem:[%s6940_s0 + $0x20] sm:$0xff] }
 0x3dc   :  { %4086 = vmatpush1.msra.mxu0 %v3792_v44 }
 0x3dd   :  { %4121 = vmatmul.mubr.f32.vlgmr.msra.gmra.mxu0 %v6663_v57 }
 0x3de   :  { %4126 = vmatprep.mubr.f32.mxu0 %v4905_v46 }
 0x3e1   :  { %4128 = vmatmul.mubr.f32.gmra.mxu0 %v6660_v5 }
 0x45d   :  { %v3239_v16 = vpop.f32.mrf.mxu1 }
 0x45f   :  { %v3241_v62 = vpop.f32.mrf.mxu1 }
 0x461   :  { %v3246_v36 = vpop.f32.mrf.mxu1 }
 0x463   :  { %v3248_v23 = vpop.f32.mrf.mxu1 }
 0x465   :  { %v3116_v39 = vpop.f32.mrf.mxu0  ;;  %v3425_v34 = vpop.f32.mrf.mxu1 }
 0x466   :  { %v3240_v11 = vadd.f32 %v3239_v16, %v3116_v39 }
 0x467   :  { %v3118_v17 = vpop.f32.mrf.mxu0  ;;  %v3427_v32 = vpop.f32.mrf.mxu1 }
 0x468   :  { %v3242_v5 = vadd.f32 %v3241_v62, %v3118_v17 }
 0x46b   :  { %v3127_v20 = vpop.f32.mrf.mxu0  ;;  %v3434_v8 = vpop.f32.mrf.mxu1 }
 0x46c   :  { %v3247_v42 = vadd.f32 %v3246_v36, %v3127_v20 }
 0x46d   :  { %v3129_v47 = vpop.f32.mrf.mxu0  ;;  %v3436_v9 = vpop.f32.mrf.mxu1 }
 0x46e   :  { %v3249_v30 = vadd.f32 %v3248_v23, %v3129_v47 }
 0x471   :  { %v3335_v19 = vpop.f32.mrf.mxu0  ;;  %v3617_v41 = vpop.f32.mrf.mxu1 }
 0x472   :  { %v3336_v24 = vadd.f32 %v3335_v19, %v3240_v11 }
 0x473   :  { %v3337_v14 = vpop.f32.mrf.mxu0  ;;  %v3619_v57 = vpop.f32.mrf.mxu1 }
 0x474   :  { %v3338_v63 = vadd.f32 %v3337_v14, %v3242_v5  ;;  %v3426_v33 = vadd.f32 %v3425_v34, %v3336_v24 }
 0x476   :  { %v3428_v25 = vadd.f32 %v3427_v32, %v3338_v63 }
 0x477   :  { %v3343_v46 = vpop.f32.mrf.mxu0  ;;  %v3624_v49 = vpop.f32.mrf.mxu1 }
 0x478   :  { %v3344_v40 = vadd.f32 %v3343_v46, %v3247_v42  ;;  %v4879_v42 = vld [vmem:[%s6940_s0 + $0x10] sm:$0xff] }
 0x479   :  { %v3345_v38 = vpop.f32.mrf.mxu0  ;;  %v3626_v18 = vpop.f32.mrf.mxu1 }
 0x47a   :  { %v3346_v27 = vadd.f32 %v3345_v38, %v3249_v30  ;;  %v3435_v55 = vadd.f32 %v3434_v8, %v3344_v40 }
 0x47c   :  { %v3437_v31 = vadd.f32 %v3436_v9, %v3346_v27 }
 0x47d   :  { %v3530_v13 = vpop.f32.mrf.mxu0  ;;  %v3831_v21 = vpop.f32.mrf.mxu1 }
 0x47e   :  { %v3531_v29 = vadd.f32 %v3530_v13, %v3426_v33 }
 0x47f   :  { %v3532_v43 = vpop.f32.mrf.mxu0  ;;  %v3833_v6 = vpop.f32.mrf.mxu1 }
 0x480   :  { %v3618_v26 = vadd.f32 %v3617_v41, %v3531_v29  ;;  %v3533_v10 = vadd.f32 %v3532_v43, %v3428_v25  ;;  %v4880_v29 = vld [vmem:[%s6940_s0 + $0x18] sm:$0xff] }
 0x482   :  { %v4221_v22 = vmul.f32 %v4875_v37, %v3618_v26  ;;  %v3620_v28 = vadd.f32 %v3619_v57, %v3533_v10  ;;  %v4881_v26 = vld [vmem:[%s6940_s0 + $0x30] sm:$0xff] }
 0x483   :  { %v3537_v52 = vpop.f32.mrf.mxu0  ;;  %v3838_v48 = vpop.f32.mrf.mxu1 }
 0x484   :  { %4229 = vst [vmem:[#allocation3] sm:$0xff] %v4221_v22  ;;  %v4222_v7 = vmul.f32 %v4876_v12, %v3620_v28  ;;  %v3538_v35 = vadd.f32 %v3537_v52, %v3435_v55  ;;  %v4882_v22 = vld [vmem:[%s6940_s0 + $0x38] sm:$0xff] }
 0x485   :  { %v3539_v1 = vpop.f32.mrf.mxu0  ;;  %v3840_v51 = vpop.f32.mrf.mxu1 }
 0x486   :  { %4230 = vst [vmem:[#allocation3 + $0x8] sm:$0xff] %v4222_v7  ;;  %v3625_v50 = vadd.f32 %v3624_v49, %v3538_v35  ;;  %v3540_v54 = vadd.f32 %v3539_v1, %v3437_v31 }
 0x488   :  { %v4225_v56 = vmul.f32 %v4877_v0, %v3625_v50  ;;  %v3627_v4 = vadd.f32 %v3626_v18, %v3540_v54 }
 0x489   :  { %v3708_v61 = vpop.f32.mrf.mxu0  ;;  %v4017_v44 = vpop.f32.mrf.mxu1 }
 0x48a   :  { %4233 = vst [vmem:[#allocation3 + $0x20] sm:$0xff] %v4225_v56  ;;  %v4226_v53 = vmul.f32 %v4878_v3, %v3627_v4  ;;  %v3832_v62 = vadd.f32 %v3831_v21, %v3708_v61 }
 0x48b   :  { %v3710_v45 = vpop.f32.mrf.mxu0  ;;  %v4019_v2 = vpop.f32.mrf.mxu1 }
 0x48c   :  { %4234 = vst [vmem:[#allocation3 + $0x28] sm:$0xff] %v4226_v53  ;;  %v3834_v23 = vadd.f32 %v3833_v6, %v3710_v45 }
 0x48f   :  { %v3719_v60 = vpop.f32.mrf.mxu0  ;;  %v4026_v58 = vpop.f32.mrf.mxu1 }
 0x490   :  { %v3839_v32 = vadd.f32 %v3838_v48, %v3719_v60 }
 0x491   :  { %v3721_v15 = vpop.f32.mrf.mxu0  ;;  %v4028_v59 = vpop.f32.mrf.mxu1 }
 0x492   :  { %v3841_v47 = vadd.f32 %v3840_v51, %v3721_v15 }
 0x495   :  { %v3927_v16 = vpop.f32.mrf.mxu0  ;;  %v4209_v34 = vpop.f32.mrf.mxu1 }
 0x496   :  { %v3928_v39 = vadd.f32 %v3927_v16, %v3832_v62 }
 0x497   :  { %v3929_v36 = vpop.f32.mrf.mxu0  ;;  %v4211_v41 = vpop.f32.mrf.mxu1 }
 0x498   :  { %v3930_v20 = vadd.f32 %v3929_v36, %v3834_v23  ;;  %v4018_v19 = vadd.f32 %v4017_v44, %v3928_v39 }
 0x499   :  { %v3935_v17 = vpop.f32.mrf.mxu0 }
 0x49a   :  { %v3936_v9 = vadd.f32 %v3935_v17, %v3839_v32  ;;  %v4020_v46 = vadd.f32 %v4019_v2, %v3930_v20  ;;  %v4216_v18 = vpop.f32.mrf.mxu1 }
 0x49b   :  { %v3937_v8 = vpop.f32.mrf.mxu0 }
 0x49c   :  { %v3938_v57 = vadd.f32 %v3937_v8, %v3841_v47  ;;  %v4027_v38 = vadd.f32 %v4026_v58, %v3936_v9  ;;  %v4218_v27 = vpop.f32.mrf.mxu1 }
 0x49d   :  { %v4122_v14 = vpop.f32.mrf.mxu0 }
 0x49e   :  { %v4123_v11 = vadd.f32 %v4122_v14, %v4018_v19  ;;  %v4029_v30 = vadd.f32 %v4028_v59, %v3938_v57 }
 0x49f   :  { %v4124_v49 = vpop.f32.mrf.mxu0 }
 0x4a0   :  { %v4210_v5 = vadd.f32 %v4209_v34, %v4123_v11  ;;  %v4125_v24 = vadd.f32 %v4124_v49, %v4020_v46 }
 0x4a1   :  { %v4129_v63 = vpop.f32.mrf.mxu0 }
 0x4a2   :  { %v4223_v33 = vmul.f32 %v4879_v42, %v4210_v5  ;;  %v4212_v13 = vadd.f32 %v4211_v41, %v4125_v24  ;;  %v4130_v21 = vadd.f32 %v4129_v63, %v4027_v38 }
 0x4a3   :  { %v4131_v40 = vpop.f32.mrf.mxu0 }
 0x4a4   :  { %4231 = vst [vmem:[#allocation3 + $0x10] sm:$0xff] %v4223_v33  ;;  %v4224_v25 = vmul.f32 %v4880_v29, %v4212_v13  ;;  %v4217_v43 = vadd.f32 %v4216_v18, %v4130_v21  ;;  %v4132_v6 = vadd.f32 %v4131_v40, %v4029_v30 }
 0x4a6   :  { %4232 = vst [vmem:[#allocation3 + $0x18] sm:$0xff] %v4224_v25  ;;  %v4227_v10 = vmul.f32 %v4881_v26, %v4217_v43  ;;  %v4219_v37 = vadd.f32 %v4218_v27, %v4132_v6 }
 0x4a8   :  { %4235 = vst [vmem:[#allocation3 + $0x30] sm:$0xff] %v4227_v10  ;;  %v4228_v28 = vmul.f32 %v4882_v22, %v4219_v37 }
 0x4aa   :  { %4236 = vst [vmem:[#allocation3 + $0x38] sm:$0xff] %v4228_v28 }
 0x4ab   :  { %4894 = shalt.err (!%p4891_p4)
}
 0x4ac   :  { %s4907_s3 = smov 512   ;;  %s4908_s25 = smov 32  }
 0x4ad   :  { %4248 = dma.vmem_to_hbm [thread:$0]  %s4243_s4, 1024, %s6948_s8, [#allocation4], %s4907_s3, %s4907_s3, %s4908_s25  }
 0x4ae   :  { %4903 = dma.done.wait [#allocation4], 1024  }
 0x4af   :  { %4904 = vsyncadd [#allocation4], 4294966272 }
 0x4b0   :  { %4252 = vsyncpa [#allocation4], 1 }

</bundles_post_ra>
